<compile_context>
chip_gen: v7x
topology: tpu7x:2x2x1
jax: 0.10.0
libtpu: 0.0.40
codegen_flags: <defaults>
</compile_context>

<pallas_src>
import functools
import math

import jax
import jax.numpy as jnp
from jax.experimental import pallas as pl
from jax.experimental.pallas import tpu as pltpu


def rnn_model_kernel(l_ref,                                   # scalar prefetch: sequence length
                     x_ref, u_ref, v_ref,
                     wih_ref, whh_ref, b_ref,
                     w1_ref, b1_ref, w2_ref, b2_ref,
                     out_ref,
                     h_ref,                                   # VMEM scratch: (L, B, 2E) hidden
                     *, n_layers, seq_len, E, C):
    l = l_ref[0]

    xd = x_ref[0]                      # (B, T)  demand
    xs = x_ref[1]                      # (B, T)  supply
    u = u_ref[...]                     # (1, 2E)
    v = v_ref[...]                     # (1, 2E)

    # zero-init hidden states (one (B, 2E) stream-fused tile per layer)
    h_ref[...] = jnp.zeros_like(h_ref)

    # Statically unrolled time loop; steps t >= l are skipped at runtime by pl.when, so after the
    # loop h_ref[L-1] holds exactly the last-layer state at t = l-1 (pack/pad + y[:, -1, :]).
    for t in range(seq_len):
        @pl.when(t < l)
        def _step(t=t):
            # layer 0: amplify + W_ih[0] folded into (u, v); only the h @ W_hh push is on the
            # t-1 -> t serial chain.
            inp = jnp.concatenate([xd[:, t:t + 1] * u[:, :E],
                                   xs[:, t:t + 1] * u[:, E:]], axis=1) + v          # (B, 2E)
            h_new = jnp.tanh(inp + jnp.dot(h_ref[0], whh_ref[0],
                                           preferred_element_type=jnp.float32))
            h_ref[0] = h_new
            prev = h_new
            # layers k >= 1: split dots (W_ih on step-t data, W_hh on step t-1 data)
            for k in range(1, n_layers):
                pre = (jnp.dot(prev, wih_ref[k], preferred_element_type=jnp.float32)
                       + jnp.dot(h_ref[k], whh_ref[k], preferred_element_type=jnp.float32)
                       + b_ref[k])
                h_new_k = jnp.tanh(pre)
                h_ref[k] = h_new_k
                prev = h_new_k

    h_last = h_ref[n_layers - 1]                               # (B, 2E) state at t = l-1

    # ---- decoder: Linear -> (Dropout = identity) -> ReLU -> Linear -> log_softmax ----
    # TODO(synk): dropout is a no-op here (inference/eval semantics).
    z = jnp.maximum(
        jnp.dot(h_last, w1_ref[...], preferred_element_type=jnp.float32) + b1_ref[...], 0.0)
    logits = jnp.dot(z, w2_ref[...], preferred_element_type=jnp.float32) + b2_ref[...]  # (B, 2C)

    def log_softmax(vv):
        m = jnp.max(vv, axis=-1, keepdims=True)
        return vv - (m + jnp.log(jnp.sum(jnp.exp(vv - m), axis=-1, keepdims=True)))

    # single lane-contiguous output slab [demand | supply]
    out_ref[...] = jnp.concatenate([log_softmax(logits[:, :C]),
                                    log_softmax(logits[:, C:])], axis=1).astype(out_ref.dtype)


def _pack_params(params, n_layers):
    """One-time host-side layout plumbing: fold amplify+layer0, transpose, block-diag packing."""
    E = params["amp_w"].shape[-1]
    C = params["dec_w2"].shape[-2]
    f32 = jnp.float32
    hi = jax.lax.Precision.HIGHEST

    amp_w = params["amp_w"].astype(f32)          # (2, 1, E)
    amp_b = params["amp_b"].astype(f32)
    w_ih = params["w_ih"].astype(f32)            # (2, L, E, E) torch (out, in)
    w_hh = params["w_hh"].astype(f32)
    b_ih = params["b_ih"].astype(f32)            # (2, L, E)
    b_hh = params["b_hh"].astype(f32)

    # fold amplify Linear(1,E) + layer-0 input projection into rank-1 affine: in0(t) = x_t*u + v
    u_parts, v_parts = [], []
    for si in range(2):
        wih0_t = w_ih[si, 0].T                                             # (E_in, E_out)
        u_parts.append(jnp.matmul(amp_w[si], wih0_t, precision=hi))        # (1, E)
        v_parts.append(jnp.matmul(amp_b[si], wih0_t, precision=hi)
                       + (b_ih[si, 0] + b_hh[si, 0])[None, :])             # (1, E)
    u = jnp.concatenate(u_parts, axis=-1)        # (1, 2E)
    v = jnp.concatenate(v_parts, axis=-1)        # (1, 2E)

    # per-layer stream-fused (block-diagonal) weights, input-major
    z_lee = jnp.zeros((n_layers, E, E), f32)

    def bdiag(a, b):                             # (L,E,E) x2 -> (L,2E,2E)
        return jnp.concatenate([jnp.concatenate([a, z_lee], axis=-1),
                                jnp.concatenate([z_lee, b], axis=-1)], axis=-2)

    wih = bdiag(jnp.swapaxes(w_ih[0], -1, -2), jnp.swapaxes(w_ih[1], -1, -2))   # (L,2E,2E); [0] unused
    whh = bdiag(jnp.swapaxes(w_hh[0], -1, -2), jnp.swapaxes(w_hh[1], -1, -2))   # (L,2E,2E)
    b_big = jnp.concatenate([b_ih[0] + b_hh[0],
                             b_ih[1] + b_hh[1]], axis=-1)[:, None, :]           # (L,1,2E); [0] unused

    z_ee = jnp.zeros((E, E), f32)
    w1 = jnp.concatenate([
        jnp.concatenate([params["dec_w1"][0].T, z_ee], axis=-1),
        jnp.concatenate([z_ee, params["dec_w1"][1].T], axis=-1),
    ], axis=0).astype(f32)                                                      # (2E, 2E)
    b1 = jnp.concatenate([params["dec_b1"][0], params["dec_b1"][1]], axis=-1).astype(f32)   # (1,2E)

    z_ec = jnp.zeros((E, C), f32)
    w2 = jnp.concatenate([
        jnp.concatenate([params["dec_w2"][0].T, z_ec], axis=-1),
        jnp.concatenate([z_ec, params["dec_w2"][1].T], axis=-1),
    ], axis=0).astype(f32)                                                      # (2E, 2C)
    b2 = jnp.concatenate([params["dec_b2"][0], params["dec_b2"][1]], axis=-1).astype(f32)   # (1,2C)

    return u, v, wih, whh, b_big, w1, b1, w2, b2


def rnn_model_forward(d_x, s_x, l, params, *, n_layers):
    """Pallas implementation of BaseRNNModel.forward (returns (d_y, s_y))."""
    B, T = d_x.shape
    E = params["amp_w"].shape[-1]
    C = params["dec_w2"].shape[-2]

    # contract from pack_padded_sequence: 1 <= l <= T (h stays zeros otherwise).
    if isinstance(l, int):
        assert 1 <= l <= T, "sequence length l must satisfy 1 <= l <= T"

    x = jnp.stack([d_x, s_x], axis=0).astype(jnp.float32)          # (2, B, T)
    l_arr = jnp.asarray([l], dtype=jnp.int32)
    u, v, wih, whh, b_big, w1, b1, w2, b2 = _pack_params(params, n_layers)

    kernel = functools.partial(rnn_model_kernel, n_layers=n_layers, seq_len=T, E=E, C=C)

    grid_spec = pltpu.PrefetchScalarGridSpec(
        num_scalar_prefetch=1,
        grid=(1,),
        in_specs=[
            pl.BlockSpec((2, B, T), lambda i, l_ref: (0, 0, 0)),                    # x
            pl.BlockSpec((1, 2 * E), lambda i, l_ref: (0, 0)),                      # u
            pl.BlockSpec((1, 2 * E), lambda i, l_ref: (0, 0)),                      # v
            pl.BlockSpec((n_layers, 2 * E, 2 * E), lambda i, l_ref: (0, 0, 0)),     # wih
            pl.BlockSpec((n_layers, 2 * E, 2 * E), lambda i, l_ref: (0, 0, 0)),     # whh
            pl.BlockSpec((n_layers, 1, 2 * E), lambda i, l_ref: (0, 0, 0)),         # b_big
            pl.BlockSpec((2 * E, 2 * E), lambda i, l_ref: (0, 0)),                  # w1
            pl.BlockSpec((1, 2 * E), lambda i, l_ref: (0, 0)),                      # b1
            pl.BlockSpec((2 * E, 2 * C), lambda i, l_ref: (0, 0)),                  # w2
            pl.BlockSpec((1, 2 * C), lambda i, l_ref: (0, 0)),                      # b2
        ],
        out_specs=pl.BlockSpec((B, 2 * C), lambda i, l_ref: (0, 0)),
        scratch_shapes=[pltpu.VMEM((n_layers, B, 2 * E), jnp.float32)],             # hidden states
    )

    flops = (2 * T * B * (2 * E) * (2 * E)                                   # layer-0 W_hh dots
             + 2 * 2 * T * max(n_layers - 1, 0) * B * (2 * E) * (2 * E)      # layers>=1: Wih+Whh
             + 2 * B * (2 * E) * (2 * E)                                     # decoder layer 1
             + 2 * B * (2 * E) * (2 * C))                                    # decoder layer 2
    transcendentals = T * n_layers * B * 2 * E + B * 2 * C
    bytes_accessed = 4 * (x.size + u.size + v.size + wih.size + whh.size + b_big.size
                          + w1.size + b1.size + w2.size + b2.size + B * 2 * C)

    out = pl.pallas_call(
        kernel,
        out_shape=jax.ShapeDtypeStruct((B, 2 * C), jnp.float32),
        grid_spec=grid_spec,
        compiler_params=pltpu.CompilerParams(dimension_semantics=("arbitrary",)),
        cost_estimate=pl.CostEstimate(flops=flops, transcendentals=transcendentals,
                                      bytes_accessed=bytes_accessed),
    )(l_arr, x, u, v, wih, whh, b_big, w1, b1, w2, b2)

    return out[:, :C], out[:, C:]


def init_params(key, E, C, n_layers, dtype=jnp.float32):
    """Deterministic synthetic parameters (torch-style uniform init by fan-in)."""
    S = 2
    ks = jax.random.split(key, 10)

    def u(k, shape, fan_in):
        b = 1.0 / math.sqrt(fan_in)
        return jax.random.uniform(k, shape, dtype, -b, b)

    return {
        "amp_w":  u(ks[0], (S, 1, E), 1),            # Linear(1, E).weight (stored as row)
        "amp_b":  u(ks[1], (S, 1, E), 1),
        "w_ih":   u(ks[2], (S, n_layers, E, E), E),  # torch layout (out_features, in_features)
        "w_hh":   u(ks[3], (S, n_layers, E, E), E),
        "b_ih":   u(ks[4], (S, n_layers, E), E),
        "b_hh":   u(ks[5], (S, n_layers, E), E),
        "dec_w1": u(ks[6], (S, E, E), E),
        "dec_b1": u(ks[7], (S, 1, E), E),
        "dec_w2": u(ks[8], (S, C, E), E),
        "dec_b2": u(ks[9], (S, 1, C), E),
    }


def ref_forward(d_x, s_x, l, params, n_layers):
    """Pure-JAX reference mirroring the PyTorch module."""
    def one(x, si):
        amp_w = params["amp_w"][si, 0]
        amp_b = params["amp_b"][si, 0]
        cur = x[:, :, None] * amp_w + amp_b          # (B, T, E)
        B, T, E = cur.shape
        for layer in range(n_layers):
            w_ih = params["w_ih"][si, layer]
            w_hh = params["w_hh"][si, layer]
            b_ih = params["b_ih"][si, layer]
            b_hh = params["b_hh"][si, layer]
            h = jnp.zeros((B, E), jnp.float32)
            outs = []
            for t in range(T):
                h = jnp.tanh(cur[:, t] @ w_ih.T + b_ih + h @ w_hh.T + b_hh)
                outs.append(h)
            cur = jnp.stack(outs, axis=1)
        h_last = cur[:, l - 1, :]
        z = jnp.maximum(h_last @ params["dec_w1"][si].T + params["dec_b1"][si, 0], 0.0)
        logits = z @ params["dec_w2"][si].T + params["dec_b2"][si, 0]
        return jax.nn.log_softmax(logits, axis=-1)
    return one(d_x, 0), one(s_x, 1)


if __name__ == "__main__":
    B, T, E, C, L = 2, 8, 32, 4, 2        # batch, seq, embed_dim, class_num, rnn_layer_num
    key = jax.random.PRNGKey(0)
    kp, kd, ks = jax.random.split(key, 3)

    params = init_params(kp, E, C, L)
    d_x = jax.random.normal(kd, (B, T), jnp.float32)
    s_x = jax.random.normal(ks, (B, T), jnp.float32)
    seq_length = 6                        # scalar l, expanded over the batch in the module

    d_y, s_y = rnn_model_forward(d_x, s_x, seq_length, params, n_layers=L)
    jax.block_until_ready((d_y, s_y))

    d_ref, s_ref = ref_forward(d_x, s_x, seq_length, params, L)
    assert d_y.shape == (B, C) and s_y.shape == (B, C)
    # single-pass (DEFAULT precision) MXU matmuls + host-side amplify fold vs f32-ish reference
    assert jnp.allclose(d_y, d_ref, atol=2e-3, rtol=2e-3)
    assert jnp.allclose(s_y, s_ref, atol=2e-3, rtol=2e-3)

    print("KERNEL_OK")
</pallas_src>

<mosaic_0001>
module attributes {stable_mosaic.version = 11 : i64} {
  func.func @rnn_model_kernel(%arg0: i32, %arg1: memref<1xi32, #tpu.memory_space<smem>>, %arg2: memref<2x2x8xf32, #tpu.memory_space<vmem>>, %arg3: memref<1x64xf32, #tpu.memory_space<vmem>>, %arg4: memref<1x64xf32, #tpu.memory_space<vmem>>, %arg5: memref<2x64x64xf32, #tpu.memory_space<vmem>>, %arg6: memref<2x64x64xf32, #tpu.memory_space<vmem>>, %arg7: memref<2x1x64xf32, #tpu.memory_space<vmem>>, %arg8: memref<64x64xf32, #tpu.memory_space<vmem>>, %arg9: memref<1x64xf32, #tpu.memory_space<vmem>>, %arg10: memref<64x8xf32, #tpu.memory_space<vmem>>, %arg11: memref<1x8xf32, #tpu.memory_space<vmem>>, %arg12: memref<2x8xf32, #tpu.memory_space<vmem>>, %arg13: memref<2x2x64xf32, #tpu.memory_space<vmem>>) attributes {dimension_semantics = [#tpu.dimension_semantics<arbitrary>], iteration_bounds = array<i64: 1>, scalar_prefetch = 1 : i64, scratch_operands = 1 : i64, tpu.core_type = #tpu.core_type<tc>, window_params = [{pipeline_mode = #tpu.pipeline_mode<synchronous>, transform_indices = @transform_0, window_bounds = array<i64: 2, 2, 8>}, {pipeline_mode = #tpu.pipeline_mode<synchronous>, transform_indices = @transform_1, window_bounds = array<i64: 1, 64>}, {pipeline_mode = #tpu.pipeline_mode<synchronous>, transform_indices = @transform_2, window_bounds = array<i64: 1, 64>}, {pipeline_mode = #tpu.pipeline_mode<synchronous>, transform_indices = @transform_3, window_bounds = array<i64: 2, 64, 64>}, {pipeline_mode = #tpu.pipeline_mode<synchronous>, transform_indices = @transform_4, window_bounds = array<i64: 2, 64, 64>}, {pipeline_mode = #tpu.pipeline_mode<synchronous>, transform_indices = @transform_5, window_bounds = array<i64: 2, 1, 64>}, {pipeline_mode = #tpu.pipeline_mode<synchronous>, transform_indices = @transform_6, window_bounds = array<i64: 64, 64>}, {pipeline_mode = #tpu.pipeline_mode<synchronous>, transform_indices = @transform_7, window_bounds = array<i64: 1, 64>}, {pipeline_mode = #tpu.pipeline_mode<synchronous>, transform_indices = @transform_8, window_bounds = array<i64: 64, 8>}, {pipeline_mode = #tpu.pipeline_mode<synchronous>, transform_indices = @transform_9, window_bounds = array<i64: 1, 8>}, {pipeline_mode = #tpu.pipeline_mode<synchronous>, transform_indices = @transform_10, window_bounds = array<i64: 2, 8>}]} {
    %c0 = arith.constant 0 : index
    %0 = memref.load %arg1[%c0] : memref<1xi32, #tpu.memory_space<smem>>
    %c0_0 = arith.constant 0 : index
    %c0_1 = arith.constant 0 : index
    %c0_2 = arith.constant 0 : index
    %1 = vector.load %arg2[%c0_0, %c0_1, %c0_2] : memref<2x2x8xf32, #tpu.memory_space<vmem>>, vector<1x2x8xf32>
    %2 = vector.shape_cast %1 : vector<1x2x8xf32> to vector<2x8xf32>
    %c1 = arith.constant 1 : index
    %c0_3 = arith.constant 0 : index
    %c0_4 = arith.constant 0 : index
    %3 = vector.load %arg2[%c1, %c0_3, %c0_4] : memref<2x2x8xf32, #tpu.memory_space<vmem>>, vector<1x2x8xf32>
    %4 = vector.shape_cast %3 : vector<1x2x8xf32> to vector<2x8xf32>
    %c0_5 = arith.constant 0 : index
    %c0_6 = arith.constant 0 : index
    %5 = vector.load %arg3[%c0_5, %c0_6] : memref<1x64xf32, #tpu.memory_space<vmem>>, vector<1x64xf32>
    %c0_7 = arith.constant 0 : index
    %c0_8 = arith.constant 0 : index
    %6 = vector.load %arg4[%c0_7, %c0_8] : memref<1x64xf32, #tpu.memory_space<vmem>>, vector<1x64xf32>
    %cst = arith.constant 0.000000e+00 : f32
    %7 = vector.broadcast %cst : f32 to vector<2x2x64xf32>
    %c0_9 = arith.constant 0 : index
    %c0_10 = arith.constant 0 : index
    %c0_11 = arith.constant 0 : index
    %8 = vector.load %arg13[%c0_9, %c0_10, %c0_11] : memref<2x2x64xf32, #tpu.memory_space<vmem>>, vector<2x2x64xf32>
    tpu.vector_store %arg13[%c0_9, %c0_10, %c0_11], %7 {strides = array<i32>} : memref<2x2x64xf32, #tpu.memory_space<vmem>>, vector<2x2x64xf32>,
    %c0_i32 = arith.constant 0 : i32
    %9 = arith.cmpi sgt, %0, %c0_i32 : i32
    %10 = arith.extui %9 : i1 to i32
    %c0_i32_12 = arith.constant 0 : i32
    %11 = arith.cmpi ne, %10, %c0_i32_12 : i32
    scf.if %11 {
      %73 = vector.extract_strided_slice %2 {offsets = [0, 0], sizes = [2, 1], strides = [1, 1]} : vector<2x8xf32> to vector<2x1xf32>
      %74 = vector.extract_strided_slice %5 {offsets = [0, 0], sizes = [1, 32], strides = [1, 1]} : vector<1x64xf32> to vector<1x32xf32>
      %75 = vector.broadcast %73 : vector<2x1xf32> to vector<2x32xf32>
      %76 = vector.broadcast %74 : vector<1x32xf32> to vector<2x32xf32>
      %77 = arith.mulf %75, %76 : vector<2x32xf32>
      %78 = vector.extract_strided_slice %4 {offsets = [0, 0], sizes = [2, 1], strides = [1, 1]} : vector<2x8xf32> to vector<2x1xf32>
      %79 = vector.extract_strided_slice %5 {offsets = [0, 32], sizes = [1, 32], strides = [1, 1]} : vector<1x64xf32> to vector<1x32xf32>
      %80 = vector.broadcast %78 : vector<2x1xf32> to vector<2x32xf32>
      %81 = vector.broadcast %79 : vector<1x32xf32> to vector<2x32xf32>
      %82 = arith.mulf %80, %81 : vector<2x32xf32>
      %83 = tpu.concatenate %77, %82 in 1 : vector<2x32xf32>, vector<2x32xf32> -> vector<2x64xf32>
      %84 = vector.broadcast %6 : vector<1x64xf32> to vector<2x64xf32>
      %85 = arith.addf %83, %84 : vector<2x64xf32>
      %c0_40 = arith.constant 0 : index
      %c0_41 = arith.constant 0 : index
      %c0_42 = arith.constant 0 : index
      %86 = vector.load %arg13[%c0_40, %c0_41, %c0_42] : memref<2x2x64xf32, #tpu.memory_space<vmem>>, vector<1x2x64xf32>
      %87 = vector.shape_cast %86 : vector<1x2x64xf32> to vector<2x64xf32>
      %c0_43 = arith.constant 0 : index
      %c0_44 = arith.constant 0 : index
      %c0_45 = arith.constant 0 : index
      %88 = vector.load %arg6[%c0_43, %c0_44, %c0_45] : memref<2x64x64xf32, #tpu.memory_space<vmem>>, vector<1x64x64xf32>
      %89 = vector.shape_cast %88 : vector<1x64x64xf32> to vector<64x64xf32>
      %cst_46 = arith.constant dense<0.000000e+00> : vector<2x64xf32>
      %90 = tpu.matmul %87, %89, %cst_46 {dimension_numbers = #tpu.dot_dimension_numbers<[1], [0], [0], [1], [0, 0, 1, 1], [], []>} : vector<2x64xf32>, vector<64x64xf32>, vector<2x64xf32> -> vector<2x64xf32>
      %91 = arith.addf %85, %90 : vector<2x64xf32>
      %92 = math.tanh %91 : vector<2x64xf32>
      %c0_47 = arith.constant 0 : index
      %c0_48 = arith.constant 0 : index
      %c0_49 = arith.constant 0 : index
      %93 = vector.load %arg13[%c0_47, %c0_48, %c0_49] : memref<2x2x64xf32, #tpu.memory_space<vmem>>, vector<1x2x64xf32>
      %94 = vector.shape_cast %93 : vector<1x2x64xf32> to vector<2x64xf32>
      %95 = vector.shape_cast %92 : vector<2x64xf32> to vector<1x2x64xf32>
      tpu.vector_store %arg13[%c0_47, %c0_48, %c0_49], %95 {strides = array<i32>} : memref<2x2x64xf32, #tpu.memory_space<vmem>>, vector<1x2x64xf32>,
      %c1_50 = arith.constant 1 : index
      %c0_51 = arith.constant 0 : index
      %c0_52 = arith.constant 0 : index
      %96 = vector.load %arg5[%c1_50, %c0_51, %c0_52] : memref<2x64x64xf32, #tpu.memory_space<vmem>>, vector<1x64x64xf32>
      %97 = vector.shape_cast %96 : vector<1x64x64xf32> to vector<64x64xf32>
      %cst_53 = arith.constant dense<0.000000e+00> : vector<2x64xf32>
      %98 = tpu.matmul %92, %97, %cst_53 {dimension_numbers = #tpu.dot_dimension_numbers<[1], [0], [0], [1], [0, 0, 1, 1], [], []>} : vector<2x64xf32>, vector<64x64xf32>, vector<2x64xf32> -> vector<2x64xf32>
      %c1_54 = arith.constant 1 : index
      %c0_55 = arith.constant 0 : index
      %c0_56 = arith.constant 0 : index
      %99 = vector.load %arg13[%c1_54, %c0_55, %c0_56] : memref<2x2x64xf32, #tpu.memory_space<vmem>>, vector<1x2x64xf32>
      %100 = vector.shape_cast %99 : vector<1x2x64xf32> to vector<2x64xf32>
      %c1_57 = arith.constant 1 : index
      %c0_58 = arith.constant 0 : index
      %c0_59 = arith.constant 0 : index
      %101 = vector.load %arg6[%c1_57, %c0_58, %c0_59] : memref<2x64x64xf32, #tpu.memory_space<vmem>>, vector<1x64x64xf32>
      %102 = vector.shape_cast %101 : vector<1x64x64xf32> to vector<64x64xf32>
      %cst_60 = arith.constant dense<0.000000e+00> : vector<2x64xf32>
      %103 = tpu.matmul %100, %102, %cst_60 {dimension_numbers = #tpu.dot_dimension_numbers<[1], [0], [0], [1], [0, 0, 1, 1], [], []>} : vector<2x64xf32>, vector<64x64xf32>, vector<2x64xf32> -> vector<2x64xf32>
      %104 = arith.addf %98, %103 : vector<2x64xf32>
      %c1_61 = arith.constant 1 : index
      %c0_62 = arith.constant 0 : index
      %c0_63 = arith.constant 0 : index
      %105 = vector.load %arg7[%c1_61, %c0_62, %c0_63] : memref<2x1x64xf32, #tpu.memory_space<vmem>>, vector<1x1x64xf32>
      %106 = vector.shape_cast %105 : vector<1x1x64xf32> to vector<1x64xf32>
      %107 = vector.broadcast %106 : vector<1x64xf32> to vector<2x64xf32>
      %108 = arith.addf %104, %107 : vector<2x64xf32>
      %109 = math.tanh %108 : vector<2x64xf32>
      %c1_64 = arith.constant 1 : index
      %c0_65 = arith.constant 0 : index
      %c0_66 = arith.constant 0 : index
      %110 = vector.load %arg13[%c1_64, %c0_65, %c0_66] : memref<2x2x64xf32, #tpu.memory_space<vmem>>, vector<1x2x64xf32>
      %111 = vector.shape_cast %110 : vector<1x2x64xf32> to vector<2x64xf32>
      %112 = vector.shape_cast %109 : vector<2x64xf32> to vector<1x2x64xf32>
      tpu.vector_store %arg13[%c1_64, %c0_65, %c0_66], %112 {strides = array<i32>} : memref<2x2x64xf32, #tpu.memory_space<vmem>>, vector<1x2x64xf32>,
    } else {
    }
    %c1_i32 = arith.constant 1 : i32
    %12 = arith.cmpi sgt, %0, %c1_i32 : i32
    %13 = arith.extui %12 : i1 to i32
    %c0_i32_13 = arith.constant 0 : i32
    %14 = arith.cmpi ne, %13, %c0_i32_13 : i32
    scf.if %14 {
      %73 = vector.extract_strided_slice %2 {offsets = [0, 1], sizes = [2, 1], strides = [1, 1]} : vector<2x8xf32> to vector<2x1xf32>
      %74 = vector.extract_strided_slice %5 {offsets = [0, 0], sizes = [1, 32], strides = [1, 1]} : vector<1x64xf32> to vector<1x32xf32>
      %75 = vector.broadcast %73 : vector<2x1xf32> to vector<2x32xf32>
      %76 = vector.broadcast %74 : vector<1x32xf32> to vector<2x32xf32>
      %77 = arith.mulf %75, %76 : vector<2x32xf32>
      %78 = vector.extract_strided_slice %4 {offsets = [0, 1], sizes = [2, 1], strides = [1, 1]} : vector<2x8xf32> to vector<2x1xf32>
      %79 = vector.extract_strided_slice %5 {offsets = [0, 32], sizes = [1, 32], strides = [1, 1]} : vector<1x64xf32> to vector<1x32xf32>
      %80 = vector.broadcast %78 : vector<2x1xf32> to vector<2x32xf32>
      %81 = vector.broadcast %79 : vector<1x32xf32> to vector<2x32xf32>
      %82 = arith.mulf %80, %81 : vector<2x32xf32>
      %83 = tpu.concatenate %77, %82 in 1 : vector<2x32xf32>, vector<2x32xf32> -> vector<2x64xf32>
      %84 = vector.broadcast %6 : vector<1x64xf32> to vector<2x64xf32>
      %85 = arith.addf %83, %84 : vector<2x64xf32>
      %c0_40 = arith.constant 0 : index
      %c0_41 = arith.constant 0 : index
      %c0_42 = arith.constant 0 : index
      %86 = vector.load %arg13[%c0_40, %c0_41, %c0_42] : memref<2x2x64xf32, #tpu.memory_space<vmem>>, vector<1x2x64xf32>
      %87 = vector.shape_cast %86 : vector<1x2x64xf32> to vector<2x64xf32>
      %c0_43 = arith.constant 0 : index
      %c0_44 = arith.constant 0 : index
      %c0_45 = arith.constant 0 : index
      %88 = vector.load %arg6[%c0_43, %c0_44, %c0_45] : memref<2x64x64xf32, #tpu.memory_space<vmem>>, vector<1x64x64xf32>
      %89 = vector.shape_cast %88 : vector<1x64x64xf32> to vector<64x64xf32>
      %cst_46 = arith.constant dense<0.000000e+00> : vector<2x64xf32>
      %90 = tpu.matmul %87, %89, %cst_46 {dimension_numbers = #tpu.dot_dimension_numbers<[1], [0], [0], [1], [0, 0, 1, 1], [], []>} : vector<2x64xf32>, vector<64x64xf32>, vector<2x64xf32> -> vector<2x64xf32>
      %91 = arith.addf %85, %90 : vector<2x64xf32>
      %92 = math.tanh %91 : vector<2x64xf32>
      %c0_47 = arith.constant 0 : index
      %c0_48 = arith.constant 0 : index
      %c0_49 = arith.constant 0 : index
      %93 = vector.load %arg13[%c0_47, %c0_48, %c0_49] : memref<2x2x64xf32, #tpu.memory_space<vmem>>, vector<1x2x64xf32>
      %94 = vector.shape_cast %93 : vector<1x2x64xf32> to vector<2x64xf32>
      %95 = vector.shape_cast %92 : vector<2x64xf32> to vector<1x2x64xf32>
      tpu.vector_store %arg13[%c0_47, %c0_48, %c0_49], %95 {strides = array<i32>} : memref<2x2x64xf32, #tpu.memory_space<vmem>>, vector<1x2x64xf32>,
      %c1_50 = arith.constant 1 : index
      %c0_51 = arith.constant 0 : index
      %c0_52 = arith.constant 0 : index
      %96 = vector.load %arg5[%c1_50, %c0_51, %c0_52] : memref<2x64x64xf32, #tpu.memory_space<vmem>>, vector<1x64x64xf32>
      %97 = vector.shape_cast %96 : vector<1x64x64xf32> to vector<64x64xf32>
      %cst_53 = arith.constant dense<0.000000e+00> : vector<2x64xf32>
      %98 = tpu.matmul %92, %97, %cst_53 {dimension_numbers = #tpu.dot_dimension_numbers<[1], [0], [0], [1], [0, 0, 1, 1], [], []>} : vector<2x64xf32>, vector<64x64xf32>, vector<2x64xf32> -> vector<2x64xf32>
      %c1_54 = arith.constant 1 : index
      %c0_55 = arith.constant 0 : index
      %c0_56 = arith.constant 0 : index
      %99 = vector.load %arg13[%c1_54, %c0_55, %c0_56] : memref<2x2x64xf32, #tpu.memory_space<vmem>>, vector<1x2x64xf32>
      %100 = vector.shape_cast %99 : vector<1x2x64xf32> to vector<2x64xf32>
      %c1_57 = arith.constant 1 : index
      %c0_58 = arith.constant 0 : index
      %c0_59 = arith.constant 0 : index
      %101 = vector.load %arg6[%c1_57, %c0_58, %c0_59] : memref<2x64x64xf32, #tpu.memory_space<vmem>>, vector<1x64x64xf32>
      %102 = vector.shape_cast %101 : vector<1x64x64xf32> to vector<64x64xf32>
      %cst_60 = arith.constant dense<0.000000e+00> : vector<2x64xf32>
      %103 = tpu.matmul %100, %102, %cst_60 {dimension_numbers = #tpu.dot_dimension_numbers<[1], [0], [0], [1], [0, 0, 1, 1], [], []>} : vector<2x64xf32>, vector<64x64xf32>, vector<2x64xf32> -> vector<2x64xf32>
      %104 = arith.addf %98, %103 : vector<2x64xf32>
      %c1_61 = arith.constant 1 : index
      %c0_62 = arith.constant 0 : index
      %c0_63 = arith.constant 0 : index
      %105 = vector.load %arg7[%c1_61, %c0_62, %c0_63] : memref<2x1x64xf32, #tpu.memory_space<vmem>>, vector<1x1x64xf32>
      %106 = vector.shape_cast %105 : vector<1x1x64xf32> to vector<1x64xf32>
      %107 = vector.broadcast %106 : vector<1x64xf32> to vector<2x64xf32>
      %108 = arith.addf %104, %107 : vector<2x64xf32>
      %109 = math.tanh %108 : vector<2x64xf32>
      %c1_64 = arith.constant 1 : index
      %c0_65 = arith.constant 0 : index
      %c0_66 = arith.constant 0 : index
      %110 = vector.load %arg13[%c1_64, %c0_65, %c0_66] : memref<2x2x64xf32, #tpu.memory_space<vmem>>, vector<1x2x64xf32>
      %111 = vector.shape_cast %110 : vector<1x2x64xf32> to vector<2x64xf32>
      %112 = vector.shape_cast %109 : vector<2x64xf32> to vector<1x2x64xf32>
      tpu.vector_store %arg13[%c1_64, %c0_65, %c0_66], %112 {strides = array<i32>} : memref<2x2x64xf32, #tpu.memory_space<vmem>>, vector<1x2x64xf32>,
    } else {
    }
    %c2_i32 = arith.constant 2 : i32
    %15 = arith.cmpi sgt, %0, %c2_i32 : i32
    %16 = arith.extui %15 : i1 to i32
    %c0_i32_14 = arith.constant 0 : i32
    %17 = arith.cmpi ne, %16, %c0_i32_14 : i32
    scf.if %17 {
      %73 = vector.extract_strided_slice %2 {offsets = [0, 2], sizes = [2, 1], strides = [1, 1]} : vector<2x8xf32> to vector<2x1xf32>
      %74 = vector.extract_strided_slice %5 {offsets = [0, 0], sizes = [1, 32], strides = [1, 1]} : vector<1x64xf32> to vector<1x32xf32>
      %75 = vector.broadcast %73 : vector<2x1xf32> to vector<2x32xf32>
      %76 = vector.broadcast %74 : vector<1x32xf32> to vector<2x32xf32>
      %77 = arith.mulf %75, %76 : vector<2x32xf32>
      %78 = vector.extract_strided_slice %4 {offsets = [0, 2], sizes = [2, 1], strides = [1, 1]} : vector<2x8xf32> to vector<2x1xf32>
      %79 = vector.extract_strided_slice %5 {offsets = [0, 32], sizes = [1, 32], strides = [1, 1]} : vector<1x64xf32> to vector<1x32xf32>
      %80 = vector.broadcast %78 : vector<2x1xf32> to vector<2x32xf32>
      %81 = vector.broadcast %79 : vector<1x32xf32> to vector<2x32xf32>
      %82 = arith.mulf %80, %81 : vector<2x32xf32>
      %83 = tpu.concatenate %77, %82 in 1 : vector<2x32xf32>, vector<2x32xf32> -> vector<2x64xf32>
      %84 = vector.broadcast %6 : vector<1x64xf32> to vector<2x64xf32>
      %85 = arith.addf %83, %84 : vector<2x64xf32>
      %c0_40 = arith.constant 0 : index
      %c0_41 = arith.constant 0 : index
      %c0_42 = arith.constant 0 : index
      %86 = vector.load %arg13[%c0_40, %c0_41, %c0_42] : memref<2x2x64xf32, #tpu.memory_space<vmem>>, vector<1x2x64xf32>
      %87 = vector.shape_cast %86 : vector<1x2x64xf32> to vector<2x64xf32>
      %c0_43 = arith.constant 0 : index
      %c0_44 = arith.constant 0 : index
      %c0_45 = arith.constant 0 : index
      %88 = vector.load %arg6[%c0_43, %c0_44, %c0_45] : memref<2x64x64xf32, #tpu.memory_space<vmem>>, vector<1x64x64xf32>
      %89 = vector.shape_cast %88 : vector<1x64x64xf32> to vector<64x64xf32>
      %cst_46 = arith.constant dense<0.000000e+00> : vector<2x64xf32>
      %90 = tpu.matmul %87, %89, %cst_46 {dimension_numbers = #tpu.dot_dimension_numbers<[1], [0], [0], [1], [0, 0, 1, 1], [], []>} : vector<2x64xf32>, vector<64x64xf32>, vector<2x64xf32> -> vector<2x64xf32>
      %91 = arith.addf %85, %90 : vector<2x64xf32>
      %92 = math.tanh %91 : vector<2x64xf32>
      %c0_47 = arith.constant 0 : index
      %c0_48 = arith.constant 0 : index
      %c0_49 = arith.constant 0 : index
      %93 = vector.load %arg13[%c0_47, %c0_48, %c0_49] : memref<2x2x64xf32, #tpu.memory_space<vmem>>, vector<1x2x64xf32>
      %94 = vector.shape_cast %93 : vector<1x2x64xf32> to vector<2x64xf32>
      %95 = vector.shape_cast %92 : vector<2x64xf32> to vector<1x2x64xf32>
      tpu.vector_store %arg13[%c0_47, %c0_48, %c0_49], %95 {strides = array<i32>} : memref<2x2x64xf32, #tpu.memory_space<vmem>>, vector<1x2x64xf32>,
      %c1_50 = arith.constant 1 : index
      %c0_51 = arith.constant 0 : index
      %c0_52 = arith.constant 0 : index
      %96 = vector.load %arg5[%c1_50, %c0_51, %c0_52] : memref<2x64x64xf32, #tpu.memory_space<vmem>>, vector<1x64x64xf32>
      %97 = vector.shape_cast %96 : vector<1x64x64xf32> to vector<64x64xf32>
      %cst_53 = arith.constant dense<0.000000e+00> : vector<2x64xf32>
      %98 = tpu.matmul %92, %97, %cst_53 {dimension_numbers = #tpu.dot_dimension_numbers<[1], [0], [0], [1], [0, 0, 1, 1], [], []>} : vector<2x64xf32>, vector<64x64xf32>, vector<2x64xf32> -> vector<2x64xf32>
      %c1_54 = arith.constant 1 : index
      %c0_55 = arith.constant 0 : index
      %c0_56 = arith.constant 0 : index
      %99 = vector.load %arg13[%c1_54, %c0_55, %c0_56] : memref<2x2x64xf32, #tpu.memory_space<vmem>>, vector<1x2x64xf32>
      %100 = vector.shape_cast %99 : vector<1x2x64xf32> to vector<2x64xf32>
      %c1_57 = arith.constant 1 : index
      %c0_58 = arith.constant 0 : index
      %c0_59 = arith.constant 0 : index
      %101 = vector.load %arg6[%c1_57, %c0_58, %c0_59] : memref<2x64x64xf32, #tpu.memory_space<vmem>>, vector<1x64x64xf32>
      %102 = vector.shape_cast %101 : vector<1x64x64xf32> to vector<64x64xf32>
      %cst_60 = arith.constant dense<0.000000e+00> : vector<2x64xf32>
      %103 = tpu.matmul %100, %102, %cst_60 {dimension_numbers = #tpu.dot_dimension_numbers<[1], [0], [0], [1], [0, 0, 1, 1], [], []>} : vector<2x64xf32>, vector<64x64xf32>, vector<2x64xf32> -> vector<2x64xf32>
      %104 = arith.addf %98, %103 : vector<2x64xf32>
      %c1_61 = arith.constant 1 : index
      %c0_62 = arith.constant 0 : index
      %c0_63 = arith.constant 0 : index
      %105 = vector.load %arg7[%c1_61, %c0_62, %c0_63] : memref<2x1x64xf32, #tpu.memory_space<vmem>>, vector<1x1x64xf32>
      %106 = vector.shape_cast %105 : vector<1x1x64xf32> to vector<1x64xf32>
      %107 = vector.broadcast %106 : vector<1x64xf32> to vector<2x64xf32>
      %108 = arith.addf %104, %107 : vector<2x64xf32>
      %109 = math.tanh %108 : vector<2x64xf32>
      %c1_64 = arith.constant 1 : index
      %c0_65 = arith.constant 0 : index
      %c0_66 = arith.constant 0 : index
      %110 = vector.load %arg13[%c1_64, %c0_65, %c0_66] : memref<2x2x64xf32, #tpu.memory_space<vmem>>, vector<1x2x64xf32>
      %111 = vector.shape_cast %110 : vector<1x2x64xf32> to vector<2x64xf32>
      %112 = vector.shape_cast %109 : vector<2x64xf32> to vector<1x2x64xf32>
      tpu.vector_store %arg13[%c1_64, %c0_65, %c0_66], %112 {strides = array<i32>} : memref<2x2x64xf32, #tpu.memory_space<vmem>>, vector<1x2x64xf32>,
    } else {
    }
    %c3_i32 = arith.constant 3 : i32
    %18 = arith.cmpi sgt, %0, %c3_i32 : i32
    %19 = arith.extui %18 : i1 to i32
    %c0_i32_15 = arith.constant 0 : i32
    %20 = arith.cmpi ne, %19, %c0_i32_15 : i32
    scf.if %20 {
      %73 = vector.extract_strided_slice %2 {offsets = [0, 3], sizes = [2, 1], strides = [1, 1]} : vector<2x8xf32> to vector<2x1xf32>
      %74 = vector.extract_strided_slice %5 {offsets = [0, 0], sizes = [1, 32], strides = [1, 1]} : vector<1x64xf32> to vector<1x32xf32>
      %75 = vector.broadcast %73 : vector<2x1xf32> to vector<2x32xf32>
      %76 = vector.broadcast %74 : vector<1x32xf32> to vector<2x32xf32>
      %77 = arith.mulf %75, %76 : vector<2x32xf32>
      %78 = vector.extract_strided_slice %4 {offsets = [0, 3], sizes = [2, 1], strides = [1, 1]} : vector<2x8xf32> to vector<2x1xf32>
      %79 = vector.extract_strided_slice %5 {offsets = [0, 32], sizes = [1, 32], strides = [1, 1]} : vector<1x64xf32> to vector<1x32xf32>
      %80 = vector.broadcast %78 : vector<2x1xf32> to vector<2x32xf32>
      %81 = vector.broadcast %79 : vector<1x32xf32> to vector<2x32xf32>
      %82 = arith.mulf %80, %81 : vector<2x32xf32>
      %83 = tpu.concatenate %77, %82 in 1 : vector<2x32xf32>, vector<2x32xf32> -> vector<2x64xf32>
      %84 = vector.broadcast %6 : vector<1x64xf32> to vector<2x64xf32>
      %85 = arith.addf %83, %84 : vector<2x64xf32>
      %c0_40 = arith.constant 0 : index
      %c0_41 = arith.constant 0 : index
      %c0_42 = arith.constant 0 : index
      %86 = vector.load %arg13[%c0_40, %c0_41, %c0_42] : memref<2x2x64xf32, #tpu.memory_space<vmem>>, vector<1x2x64xf32>
      %87 = vector.shape_cast %86 : vector<1x2x64xf32> to vector<2x64xf32>
      %c0_43 = arith.constant 0 : index
      %c0_44 = arith.constant 0 : index
      %c0_45 = arith.constant 0 : index
      %88 = vector.load %arg6[%c0_43, %c0_44, %c0_45] : memref<2x64x64xf32, #tpu.memory_space<vmem>>, vector<1x64x64xf32>
      %89 = vector.shape_cast %88 : vector<1x64x64xf32> to vector<64x64xf32>
      %cst_46 = arith.constant dense<0.000000e+00> : vector<2x64xf32>
      %90 = tpu.matmul %87, %89, %cst_46 {dimension_numbers = #tpu.dot_dimension_numbers<[1], [0], [0], [1], [0, 0, 1, 1], [], []>} : vector<2x64xf32>, vector<64x64xf32>, vector<2x64xf32> -> vector<2x64xf32>
      %91 = arith.addf %85, %90 : vector<2x64xf32>
      %92 = math.tanh %91 : vector<2x64xf32>
      %c0_47 = arith.constant 0 : index
      %c0_48 = arith.constant 0 : index
      %c0_49 = arith.constant 0 : index
      %93 = vector.load %arg13[%c0_47, %c0_48, %c0_49] : memref<2x2x64xf32, #tpu.memory_space<vmem>>, vector<1x2x64xf32>
      %94 = vector.shape_cast %93 : vector<1x2x64xf32> to vector<2x64xf32>
      %95 = vector.shape_cast %92 : vector<2x64xf32> to vector<1x2x64xf32>
      tpu.vector_store %arg13[%c0_47, %c0_48, %c0_49], %95 {strides = array<i32>} : memref<2x2x64xf32, #tpu.memory_space<vmem>>, vector<1x2x64xf32>,
      %c1_50 = arith.constant 1 : index
      %c0_51 = arith.constant 0 : index
      %c0_52 = arith.constant 0 : index
      %96 = vector.load %arg5[%c1_50, %c0_51, %c0_52] : memref<2x64x64xf32, #tpu.memory_space<vmem>>, vector<1x64x64xf32>
      %97 = vector.shape_cast %96 : vector<1x64x64xf32> to vector<64x64xf32>
      %cst_53 = arith.constant dense<0.000000e+00> : vector<2x64xf32>
      %98 = tpu.matmul %92, %97, %cst_53 {dimension_numbers = #tpu.dot_dimension_numbers<[1], [0], [0], [1], [0, 0, 1, 1], [], []>} : vector<2x64xf32>, vector<64x64xf32>, vector<2x64xf32> -> vector<2x64xf32>
      %c1_54 = arith.constant 1 : index
      %c0_55 = arith.constant 0 : index
      %c0_56 = arith.constant 0 : index
      %99 = vector.load %arg13[%c1_54, %c0_55, %c0_56] : memref<2x2x64xf32, #tpu.memory_space<vmem>>, vector<1x2x64xf32>
      %100 = vector.shape_cast %99 : vector<1x2x64xf32> to vector<2x64xf32>
      %c1_57 = arith.constant 1 : index
      %c0_58 = arith.constant 0 : index
      %c0_59 = arith.constant 0 : index
      %101 = vector.load %arg6[%c1_57, %c0_58, %c0_59] : memref<2x64x64xf32, #tpu.memory_space<vmem>>, vector<1x64x64xf32>
      %102 = vector.shape_cast %101 : vector<1x64x64xf32> to vector<64x64xf32>
      %cst_60 = arith.constant dense<0.000000e+00> : vector<2x64xf32>
      %103 = tpu.matmul %100, %102, %cst_60 {dimension_numbers = #tpu.dot_dimension_numbers<[1], [0], [0], [1], [0, 0, 1, 1], [], []>} : vector<2x64xf32>, vector<64x64xf32>, vector<2x64xf32> -> vector<2x64xf32>
      %104 = arith.addf %98, %103 : vector<2x64xf32>
      %c1_61 = arith.constant 1 : index
      %c0_62 = arith.constant 0 : index
      %c0_63 = arith.constant 0 : index
      %105 = vector.load %arg7[%c1_61, %c0_62, %c0_63] : memref<2x1x64xf32, #tpu.memory_space<vmem>>, vector<1x1x64xf32>
      %106 = vector.shape_cast %105 : vector<1x1x64xf32> to vector<1x64xf32>
      %107 = vector.broadcast %106 : vector<1x64xf32> to vector<2x64xf32>
      %108 = arith.addf %104, %107 : vector<2x64xf32>
      %109 = math.tanh %108 : vector<2x64xf32>
      %c1_64 = arith.constant 1 : index
      %c0_65 = arith.constant 0 : index
      %c0_66 = arith.constant 0 : index
      %110 = vector.load %arg13[%c1_64, %c0_65, %c0_66] : memref<2x2x64xf32, #tpu.memory_space<vmem>>, vector<1x2x64xf32>
      %111 = vector.shape_cast %110 : vector<1x2x64xf32> to vector<2x64xf32>
      %112 = vector.shape_cast %109 : vector<2x64xf32> to vector<1x2x64xf32>
      tpu.vector_store %arg13[%c1_64, %c0_65, %c0_66], %112 {strides = array<i32>} : memref<2x2x64xf32, #tpu.memory_space<vmem>>, vector<1x2x64xf32>,
    } else {
    }
    %c4_i32 = arith.constant 4 : i32
    %21 = arith.cmpi sgt, %0, %c4_i32 : i32
    %22 = arith.extui %21 : i1 to i32
    %c0_i32_16 = arith.constant 0 : i32
    %23 = arith.cmpi ne, %22, %c0_i32_16 : i32
    scf.if %23 {
      %73 = vector.extract_strided_slice %2 {offsets = [0, 4], sizes = [2, 1], strides = [1, 1]} : vector<2x8xf32> to vector<2x1xf32>
      %74 = vector.extract_strided_slice %5 {offsets = [0, 0], sizes = [1, 32], strides = [1, 1]} : vector<1x64xf32> to vector<1x32xf32>
      %75 = vector.broadcast %73 : vector<2x1xf32> to vector<2x32xf32>
      %76 = vector.broadcast %74 : vector<1x32xf32> to vector<2x32xf32>
      %77 = arith.mulf %75, %76 : vector<2x32xf32>
      %78 = vector.extract_strided_slice %4 {offsets = [0, 4], sizes = [2, 1], strides = [1, 1]} : vector<2x8xf32> to vector<2x1xf32>
      %79 = vector.extract_strided_slice %5 {offsets = [0, 32], sizes = [1, 32], strides = [1, 1]} : vector<1x64xf32> to vector<1x32xf32>
      %80 = vector.broadcast %78 : vector<2x1xf32> to vector<2x32xf32>
      %81 = vector.broadcast %79 : vector<1x32xf32> to vector<2x32xf32>
      %82 = arith.mulf %80, %81 : vector<2x32xf32>
      %83 = tpu.concatenate %77, %82 in 1 : vector<2x32xf32>, vector<2x32xf32> -> vector<2x64xf32>
      %84 = vector.broadcast %6 : vector<1x64xf32> to vector<2x64xf32>
      %85 = arith.addf %83, %84 : vector<2x64xf32>
      %c0_40 = arith.constant 0 : index
      %c0_41 = arith.constant 0 : index
      %c0_42 = arith.constant 0 : index
      %86 = vector.load %arg13[%c0_40, %c0_41, %c0_42] : memref<2x2x64xf32, #tpu.memory_space<vmem>>, vector<1x2x64xf32>
      %87 = vector.shape_cast %86 : vector<1x2x64xf32> to vector<2x64xf32>
      %c0_43 = arith.constant 0 : index
      %c0_44 = arith.constant 0 : index
      %c0_45 = arith.constant 0 : index
      %88 = vector.load %arg6[%c0_43, %c0_44, %c0_45] : memref<2x64x64xf32, #tpu.memory_space<vmem>>, vector<1x64x64xf32>
      %89 = vector.shape_cast %88 : vector<1x64x64xf32> to vector<64x64xf32>
      %cst_46 = arith.constant dense<0.000000e+00> : vector<2x64xf32>
      %90 = tpu.matmul %87, %89, %cst_46 {dimension_numbers = #tpu.dot_dimension_numbers<[1], [0], [0], [1], [0, 0, 1, 1], [], []>} : vector<2x64xf32>, vector<64x64xf32>, vector<2x64xf32> -> vector<2x64xf32>
      %91 = arith.addf %85, %90 : vector<2x64xf32>
      %92 = math.tanh %91 : vector<2x64xf32>
      %c0_47 = arith.constant 0 : index
      %c0_48 = arith.constant 0 : index
      %c0_49 = arith.constant 0 : index
      %93 = vector.load %arg13[%c0_47, %c0_48, %c0_49] : memref<2x2x64xf32, #tpu.memory_space<vmem>>, vector<1x2x64xf32>
      %94 = vector.shape_cast %93 : vector<1x2x64xf32> to vector<2x64xf32>
      %95 = vector.shape_cast %92 : vector<2x64xf32> to vector<1x2x64xf32>
      tpu.vector_store %arg13[%c0_47, %c0_48, %c0_49], %95 {strides = array<i32>} : memref<2x2x64xf32, #tpu.memory_space<vmem>>, vector<1x2x64xf32>,
      %c1_50 = arith.constant 1 : index
      %c0_51 = arith.constant 0 : index
      %c0_52 = arith.constant 0 : index
      %96 = vector.load %arg5[%c1_50, %c0_51, %c0_52] : memref<2x64x64xf32, #tpu.memory_space<vmem>>, vector<1x64x64xf32>
      %97 = vector.shape_cast %96 : vector<1x64x64xf32> to vector<64x64xf32>
      %cst_53 = arith.constant dense<0.000000e+00> : vector<2x64xf32>
      %98 = tpu.matmul %92, %97, %cst_53 {dimension_numbers = #tpu.dot_dimension_numbers<[1], [0], [0], [1], [0, 0, 1, 1], [], []>} : vector<2x64xf32>, vector<64x64xf32>, vector<2x64xf32> -> vector<2x64xf32>
      %c1_54 = arith.constant 1 : index
      %c0_55 = arith.constant 0 : index
      %c0_56 = arith.constant 0 : index
      %99 = vector.load %arg13[%c1_54, %c0_55, %c0_56] : memref<2x2x64xf32, #tpu.memory_space<vmem>>, vector<1x2x64xf32>
      %100 = vector.shape_cast %99 : vector<1x2x64xf32> to vector<2x64xf32>
      %c1_57 = arith.constant 1 : index
      %c0_58 = arith.constant 0 : index
      %c0_59 = arith.constant 0 : index
      %101 = vector.load %arg6[%c1_57, %c0_58, %c0_59] : memref<2x64x64xf32, #tpu.memory_space<vmem>>, vector<1x64x64xf32>
      %102 = vector.shape_cast %101 : vector<1x64x64xf32> to vector<64x64xf32>
      %cst_60 = arith.constant dense<0.000000e+00> : vector<2x64xf32>
      %103 = tpu.matmul %100, %102, %cst_60 {dimension_numbers = #tpu.dot_dimension_numbers<[1], [0], [0], [1], [0, 0, 1, 1], [], []>} : vector<2x64xf32>, vector<64x64xf32>, vector<2x64xf32> -> vector<2x64xf32>
      %104 = arith.addf %98, %103 : vector<2x64xf32>
      %c1_61 = arith.constant 1 : index
      %c0_62 = arith.constant 0 : index
      %c0_63 = arith.constant 0 : index
      %105 = vector.load %arg7[%c1_61, %c0_62, %c0_63] : memref<2x1x64xf32, #tpu.memory_space<vmem>>, vector<1x1x64xf32>
      %106 = vector.shape_cast %105 : vector<1x1x64xf32> to vector<1x64xf32>
      %107 = vector.broadcast %106 : vector<1x64xf32> to vector<2x64xf32>
      %108 = arith.addf %104, %107 : vector<2x64xf32>
      %109 = math.tanh %108 : vector<2x64xf32>
      %c1_64 = arith.constant 1 : index
      %c0_65 = arith.constant 0 : index
      %c0_66 = arith.constant 0 : index
      %110 = vector.load %arg13[%c1_64, %c0_65, %c0_66] : memref<2x2x64xf32, #tpu.memory_space<vmem>>, vector<1x2x64xf32>
      %111 = vector.shape_cast %110 : vector<1x2x64xf32> to vector<2x64xf32>
      %112 = vector.shape_cast %109 : vector<2x64xf32> to vector<1x2x64xf32>
      tpu.vector_store %arg13[%c1_64, %c0_65, %c0_66], %112 {strides = array<i32>} : memref<2x2x64xf32, #tpu.memory_space<vmem>>, vector<1x2x64xf32>,
    } else {
    }
    %c5_i32 = arith.constant 5 : i32
    %24 = arith.cmpi sgt, %0, %c5_i32 : i32
    %25 = arith.extui %24 : i1 to i32
    %c0_i32_17 = arith.constant 0 : i32
    %26 = arith.cmpi ne, %25, %c0_i32_17 : i32
    scf.if %26 {
      %73 = vector.extract_strided_slice %2 {offsets = [0, 5], sizes = [2, 1], strides = [1, 1]} : vector<2x8xf32> to vector<2x1xf32>
      %74 = vector.extract_strided_slice %5 {offsets = [0, 0], sizes = [1, 32], strides = [1, 1]} : vector<1x64xf32> to vector<1x32xf32>
      %75 = vector.broadcast %73 : vector<2x1xf32> to vector<2x32xf32>
      %76 = vector.broadcast %74 : vector<1x32xf32> to vector<2x32xf32>
      %77 = arith.mulf %75, %76 : vector<2x32xf32>
      %78 = vector.extract_strided_slice %4 {offsets = [0, 5], sizes = [2, 1], strides = [1, 1]} : vector<2x8xf32> to vector<2x1xf32>
      %79 = vector.extract_strided_slice %5 {offsets = [0, 32], sizes = [1, 32], strides = [1, 1]} : vector<1x64xf32> to vector<1x32xf32>
      %80 = vector.broadcast %78 : vector<2x1xf32> to vector<2x32xf32>
      %81 = vector.broadcast %79 : vector<1x32xf32> to vector<2x32xf32>
      %82 = arith.mulf %80, %81 : vector<2x32xf32>
      %83 = tpu.concatenate %77, %82 in 1 : vector<2x32xf32>, vector<2x32xf32> -> vector<2x64xf32>
      %84 = vector.broadcast %6 : vector<1x64xf32> to vector<2x64xf32>
      %85 = arith.addf %83, %84 : vector<2x64xf32>
      %c0_40 = arith.constant 0 : index
      %c0_41 = arith.constant 0 : index
      %c0_42 = arith.constant 0 : index
      %86 = vector.load %arg13[%c0_40, %c0_41, %c0_42] : memref<2x2x64xf32, #tpu.memory_space<vmem>>, vector<1x2x64xf32>
      %87 = vector.shape_cast %86 : vector<1x2x64xf32> to vector<2x64xf32>
      %c0_43 = arith.constant 0 : index
      %c0_44 = arith.constant 0 : index
      %c0_45 = arith.constant 0 : index
      %88 = vector.load %arg6[%c0_43, %c0_44, %c0_45] : memref<2x64x64xf32, #tpu.memory_space<vmem>>, vector<1x64x64xf32>
      %89 = vector.shape_cast %88 : vector<1x64x64xf32> to vector<64x64xf32>
      %cst_46 = arith.constant dense<0.000000e+00> : vector<2x64xf32>
      %90 = tpu.matmul %87, %89, %cst_46 {dimension_numbers = #tpu.dot_dimension_numbers<[1], [0], [0], [1], [0, 0, 1, 1], [], []>} : vector<2x64xf32>, vector<64x64xf32>, vector<2x64xf32> -> vector<2x64xf32>
      %91 = arith.addf %85, %90 : vector<2x64xf32>
      %92 = math.tanh %91 : vector<2x64xf32>
      %c0_47 = arith.constant 0 : index
      %c0_48 = arith.constant 0 : index
      %c0_49 = arith.constant 0 : index
      %93 = vector.load %arg13[%c0_47, %c0_48, %c0_49] : memref<2x2x64xf32, #tpu.memory_space<vmem>>, vector<1x2x64xf32>
      %94 = vector.shape_cast %93 : vector<1x2x64xf32> to vector<2x64xf32>
      %95 = vector.shape_cast %92 : vector<2x64xf32> to vector<1x2x64xf32>
      tpu.vector_store %arg13[%c0_47, %c0_48, %c0_49], %95 {strides = array<i32>} : memref<2x2x64xf32, #tpu.memory_space<vmem>>, vector<1x2x64xf32>,
      %c1_50 = arith.constant 1 : index
      %c0_51 = arith.constant 0 : index
      %c0_52 = arith.constant 0 : index
      %96 = vector.load %arg5[%c1_50, %c0_51, %c0_52] : memref<2x64x64xf32, #tpu.memory_space<vmem>>, vector<1x64x64xf32>
      %97 = vector.shape_cast %96 : vector<1x64x64xf32> to vector<64x64xf32>
      %cst_53 = arith.constant dense<0.000000e+00> : vector<2x64xf32>
      %98 = tpu.matmul %92, %97, %cst_53 {dimension_numbers = #tpu.dot_dimension_numbers<[1], [0], [0], [1], [0, 0, 1, 1], [], []>} : vector<2x64xf32>, vector<64x64xf32>, vector<2x64xf32> -> vector<2x64xf32>
      %c1_54 = arith.constant 1 : index
      %c0_55 = arith.constant 0 : index
      %c0_56 = arith.constant 0 : index
      %99 = vector.load %arg13[%c1_54, %c0_55, %c0_56] : memref<2x2x64xf32, #tpu.memory_space<vmem>>, vector<1x2x64xf32>
      %100 = vector.shape_cast %99 : vector<1x2x64xf32> to vector<2x64xf32>
      %c1_57 = arith.constant 1 : index
      %c0_58 = arith.constant 0 : index
      %c0_59 = arith.constant 0 : index
      %101 = vector.load %arg6[%c1_57, %c0_58, %c0_59] : memref<2x64x64xf32, #tpu.memory_space<vmem>>, vector<1x64x64xf32>
      %102 = vector.shape_cast %101 : vector<1x64x64xf32> to vector<64x64xf32>
      %cst_60 = arith.constant dense<0.000000e+00> : vector<2x64xf32>
      %103 = tpu.matmul %100, %102, %cst_60 {dimension_numbers = #tpu.dot_dimension_numbers<[1], [0], [0], [1], [0, 0, 1, 1], [], []>} : vector<2x64xf32>, vector<64x64xf32>, vector<2x64xf32> -> vector<2x64xf32>
      %104 = arith.addf %98, %103 : vector<2x64xf32>
      %c1_61 = arith.constant 1 : index
      %c0_62 = arith.constant 0 : index
      %c0_63 = arith.constant 0 : index
      %105 = vector.load %arg7[%c1_61, %c0_62, %c0_63] : memref<2x1x64xf32, #tpu.memory_space<vmem>>, vector<1x1x64xf32>
      %106 = vector.shape_cast %105 : vector<1x1x64xf32> to vector<1x64xf32>
      %107 = vector.broadcast %106 : vector<1x64xf32> to vector<2x64xf32>
      %108 = arith.addf %104, %107 : vector<2x64xf32>
      %109 = math.tanh %108 : vector<2x64xf32>
      %c1_64 = arith.constant 1 : index
      %c0_65 = arith.constant 0 : index
      %c0_66 = arith.constant 0 : index
      %110 = vector.load %arg13[%c1_64, %c0_65, %c0_66] : memref<2x2x64xf32, #tpu.memory_space<vmem>>, vector<1x2x64xf32>
      %111 = vector.shape_cast %110 : vector<1x2x64xf32> to vector<2x64xf32>
      %112 = vector.shape_cast %109 : vector<2x64xf32> to vector<1x2x64xf32>
      tpu.vector_store %arg13[%c1_64, %c0_65, %c0_66], %112 {strides = array<i32>} : memref<2x2x64xf32, #tpu.memory_space<vmem>>, vector<1x2x64xf32>,
    } else {
    }
    %c6_i32 = arith.constant 6 : i32
    %27 = arith.cmpi sgt, %0, %c6_i32 : i32
    %28 = arith.extui %27 : i1 to i32
    %c0_i32_18 = arith.constant 0 : i32
    %29 = arith.cmpi ne, %28, %c0_i32_18 : i32
    scf.if %29 {
      %73 = vector.extract_strided_slice %2 {offsets = [0, 6], sizes = [2, 1], strides = [1, 1]} : vector<2x8xf32> to vector<2x1xf32>
      %74 = vector.extract_strided_slice %5 {offsets = [0, 0], sizes = [1, 32], strides = [1, 1]} : vector<1x64xf32> to vector<1x32xf32>
      %75 = vector.broadcast %73 : vector<2x1xf32> to vector<2x32xf32>
      %76 = vector.broadcast %74 : vector<1x32xf32> to vector<2x32xf32>
      %77 = arith.mulf %75, %76 : vector<2x32xf32>
      %78 = vector.extract_strided_slice %4 {offsets = [0, 6], sizes = [2, 1], strides = [1, 1]} : vector<2x8xf32> to vector<2x1xf32>
      %79 = vector.extract_strided_slice %5 {offsets = [0, 32], sizes = [1, 32], strides = [1, 1]} : vector<1x64xf32> to vector<1x32xf32>
      %80 = vector.broadcast %78 : vector<2x1xf32> to vector<2x32xf32>
      %81 = vector.broadcast %79 : vector<1x32xf32> to vector<2x32xf32>
      %82 = arith.mulf %80, %81 : vector<2x32xf32>
      %83 = tpu.concatenate %77, %82 in 1 : vector<2x32xf32>, vector<2x32xf32> -> vector<2x64xf32>
      %84 = vector.broadcast %6 : vector<1x64xf32> to vector<2x64xf32>
      %85 = arith.addf %83, %84 : vector<2x64xf32>
      %c0_40 = arith.constant 0 : index
      %c0_41 = arith.constant 0 : index
      %c0_42 = arith.constant 0 : index
      %86 = vector.load %arg13[%c0_40, %c0_41, %c0_42] : memref<2x2x64xf32, #tpu.memory_space<vmem>>, vector<1x2x64xf32>
      %87 = vector.shape_cast %86 : vector<1x2x64xf32> to vector<2x64xf32>
      %c0_43 = arith.constant 0 : index
      %c0_44 = arith.constant 0 : index
      %c0_45 = arith.constant 0 : index
      %88 = vector.load %arg6[%c0_43, %c0_44, %c0_45] : memref<2x64x64xf32, #tpu.memory_space<vmem>>, vector<1x64x64xf32>
      %89 = vector.shape_cast %88 : vector<1x64x64xf32> to vector<64x64xf32>
      %cst_46 = arith.constant dense<0.000000e+00> : vector<2x64xf32>
      %90 = tpu.matmul %87, %89, %cst_46 {dimension_numbers = #tpu.dot_dimension_numbers<[1], [0], [0], [1], [0, 0, 1, 1], [], []>} : vector<2x64xf32>, vector<64x64xf32>, vector<2x64xf32> -> vector<2x64xf32>
      %91 = arith.addf %85, %90 : vector<2x64xf32>
      %92 = math.tanh %91 : vector<2x64xf32>
      %c0_47 = arith.constant 0 : index
      %c0_48 = arith.constant 0 : index
      %c0_49 = arith.constant 0 : index
      %93 = vector.load %arg13[%c0_47, %c0_48, %c0_49] : memref<2x2x64xf32, #tpu.memory_space<vmem>>, vector<1x2x64xf32>
      %94 = vector.shape_cast %93 : vector<1x2x64xf32> to vector<2x64xf32>
      %95 = vector.shape_cast %92 : vector<2x64xf32> to vector<1x2x64xf32>
      tpu.vector_store %arg13[%c0_47, %c0_48, %c0_49], %95 {strides = array<i32>} : memref<2x2x64xf32, #tpu.memory_space<vmem>>, vector<1x2x64xf32>,
      %c1_50 = arith.constant 1 : index
      %c0_51 = arith.constant 0 : index
      %c0_52 = arith.constant 0 : index
      %96 = vector.load %arg5[%c1_50, %c0_51, %c0_52] : memref<2x64x64xf32, #tpu.memory_space<vmem>>, vector<1x64x64xf32>
      %97 = vector.shape_cast %96 : vector<1x64x64xf32> to vector<64x64xf32>
      %cst_53 = arith.constant dense<0.000000e+00> : vector<2x64xf32>
      %98 = tpu.matmul %92, %97, %cst_53 {dimension_numbers = #tpu.dot_dimension_numbers<[1], [0], [0], [1], [0, 0, 1, 1], [], []>} : vector<2x64xf32>, vector<64x64xf32>, vector<2x64xf32> -> vector<2x64xf32>
      %c1_54 = arith.constant 1 : index
      %c0_55 = arith.constant 0 : index
      %c0_56 = arith.constant 0 : index
      %99 = vector.load %arg13[%c1_54, %c0_55, %c0_56] : memref<2x2x64xf32, #tpu.memory_space<vmem>>, vector<1x2x64xf32>
      %100 = vector.shape_cast %99 : vector<1x2x64xf32> to vector<2x64xf32>
      %c1_57 = arith.constant 1 : index
      %c0_58 = arith.constant 0 : index
      %c0_59 = arith.constant 0 : index
      %101 = vector.load %arg6[%c1_57, %c0_58, %c0_59] : memref<2x64x64xf32, #tpu.memory_space<vmem>>, vector<1x64x64xf32>
      %102 = vector.shape_cast %101 : vector<1x64x64xf32> to vector<64x64xf32>
      %cst_60 = arith.constant dense<0.000000e+00> : vector<2x64xf32>
      %103 = tpu.matmul %100, %102, %cst_60 {dimension_numbers = #tpu.dot_dimension_numbers<[1], [0], [0], [1], [0, 0, 1, 1], [], []>} : vector<2x64xf32>, vector<64x64xf32>, vector<2x64xf32> -> vector<2x64xf32>
      %104 = arith.addf %98, %103 : vector<2x64xf32>
      %c1_61 = arith.constant 1 : index
      %c0_62 = arith.constant 0 : index
      %c0_63 = arith.constant 0 : index
      %105 = vector.load %arg7[%c1_61, %c0_62, %c0_63] : memref<2x1x64xf32, #tpu.memory_space<vmem>>, vector<1x1x64xf32>
      %106 = vector.shape_cast %105 : vector<1x1x64xf32> to vector<1x64xf32>
      %107 = vector.broadcast %106 : vector<1x64xf32> to vector<2x64xf32>
      %108 = arith.addf %104, %107 : vector<2x64xf32>
      %109 = math.tanh %108 : vector<2x64xf32>
      %c1_64 = arith.constant 1 : index
      %c0_65 = arith.constant 0 : index
      %c0_66 = arith.constant 0 : index
      %110 = vector.load %arg13[%c1_64, %c0_65, %c0_66] : memref<2x2x64xf32, #tpu.memory_space<vmem>>, vector<1x2x64xf32>
      %111 = vector.shape_cast %110 : vector<1x2x64xf32> to vector<2x64xf32>
      %112 = vector.shape_cast %109 : vector<2x64xf32> to vector<1x2x64xf32>
      tpu.vector_store %arg13[%c1_64, %c0_65, %c0_66], %112 {strides = array<i32>} : memref<2x2x64xf32, #tpu.memory_space<vmem>>, vector<1x2x64xf32>,
    } else {
    }
    %c7_i32 = arith.constant 7 : i32
    %30 = arith.cmpi sgt, %0, %c7_i32 : i32
    %31 = arith.extui %30 : i1 to i32
    %c0_i32_19 = arith.constant 0 : i32
    %32 = arith.cmpi ne, %31, %c0_i32_19 : i32
    scf.if %32 {
      %73 = vector.extract_strided_slice %2 {offsets = [0, 7], sizes = [2, 1], strides = [1, 1]} : vector<2x8xf32> to vector<2x1xf32>
      %74 = vector.extract_strided_slice %5 {offsets = [0, 0], sizes = [1, 32], strides = [1, 1]} : vector<1x64xf32> to vector<1x32xf32>
      %75 = vector.broadcast %73 : vector<2x1xf32> to vector<2x32xf32>
      %76 = vector.broadcast %74 : vector<1x32xf32> to vector<2x32xf32>
      %77 = arith.mulf %75, %76 : vector<2x32xf32>
      %78 = vector.extract_strided_slice %4 {offsets = [0, 7], sizes = [2, 1], strides = [1, 1]} : vector<2x8xf32> to vector<2x1xf32>
      %79 = vector.extract_strided_slice %5 {offsets = [0, 32], sizes = [1, 32], strides = [1, 1]} : vector<1x64xf32> to vector<1x32xf32>
      %80 = vector.broadcast %78 : vector<2x1xf32> to vector<2x32xf32>
      %81 = vector.broadcast %79 : vector<1x32xf32> to vector<2x32xf32>
      %82 = arith.mulf %80, %81 : vector<2x32xf32>
      %83 = tpu.concatenate %77, %82 in 1 : vector<2x32xf32>, vector<2x32xf32> -> vector<2x64xf32>
      %84 = vector.broadcast %6 : vector<1x64xf32> to vector<2x64xf32>
      %85 = arith.addf %83, %84 : vector<2x64xf32>
      %c0_40 = arith.constant 0 : index
      %c0_41 = arith.constant 0 : index
      %c0_42 = arith.constant 0 : index
      %86 = vector.load %arg13[%c0_40, %c0_41, %c0_42] : memref<2x2x64xf32, #tpu.memory_space<vmem>>, vector<1x2x64xf32>
      %87 = vector.shape_cast %86 : vector<1x2x64xf32> to vector<2x64xf32>
      %c0_43 = arith.constant 0 : index
      %c0_44 = arith.constant 0 : index
      %c0_45 = arith.constant 0 : index
      %88 = vector.load %arg6[%c0_43, %c0_44, %c0_45] : memref<2x64x64xf32, #tpu.memory_space<vmem>>, vector<1x64x64xf32>
      %89 = vector.shape_cast %88 : vector<1x64x64xf32> to vector<64x64xf32>
      %cst_46 = arith.constant dense<0.000000e+00> : vector<2x64xf32>
      %90 = tpu.matmul %87, %89, %cst_46 {dimension_numbers = #tpu.dot_dimension_numbers<[1], [0], [0], [1], [0, 0, 1, 1], [], []>} : vector<2x64xf32>, vector<64x64xf32>, vector<2x64xf32> -> vector<2x64xf32>
      %91 = arith.addf %85, %90 : vector<2x64xf32>
      %92 = math.tanh %91 : vector<2x64xf32>
      %c0_47 = arith.constant 0 : index
      %c0_48 = arith.constant 0 : index
      %c0_49 = arith.constant 0 : index
      %93 = vector.load %arg13[%c0_47, %c0_48, %c0_49] : memref<2x2x64xf32, #tpu.memory_space<vmem>>, vector<1x2x64xf32>
      %94 = vector.shape_cast %93 : vector<1x2x64xf32> to vector<2x64xf32>
      %95 = vector.shape_cast %92 : vector<2x64xf32> to vector<1x2x64xf32>
      tpu.vector_store %arg13[%c0_47, %c0_48, %c0_49], %95 {strides = array<i32>} : memref<2x2x64xf32, #tpu.memory_space<vmem>>, vector<1x2x64xf32>,
      %c1_50 = arith.constant 1 : index
      %c0_51 = arith.constant 0 : index
      %c0_52 = arith.constant 0 : index
      %96 = vector.load %arg5[%c1_50, %c0_51, %c0_52] : memref<2x64x64xf32, #tpu.memory_space<vmem>>, vector<1x64x64xf32>
      %97 = vector.shape_cast %96 : vector<1x64x64xf32> to vector<64x64xf32>
      %cst_53 = arith.constant dense<0.000000e+00> : vector<2x64xf32>
      %98 = tpu.matmul %92, %97, %cst_53 {dimension_numbers = #tpu.dot_dimension_numbers<[1], [0], [0], [1], [0, 0, 1, 1], [], []>} : vector<2x64xf32>, vector<64x64xf32>, vector<2x64xf32> -> vector<2x64xf32>
      %c1_54 = arith.constant 1 : index
      %c0_55 = arith.constant 0 : index
      %c0_56 = arith.constant 0 : index
      %99 = vector.load %arg13[%c1_54, %c0_55, %c0_56] : memref<2x2x64xf32, #tpu.memory_space<vmem>>, vector<1x2x64xf32>
      %100 = vector.shape_cast %99 : vector<1x2x64xf32> to vector<2x64xf32>
      %c1_57 = arith.constant 1 : index
      %c0_58 = arith.constant 0 : index
      %c0_59 = arith.constant 0 : index
      %101 = vector.load %arg6[%c1_57, %c0_58, %c0_59] : memref<2x64x64xf32, #tpu.memory_space<vmem>>, vector<1x64x64xf32>
      %102 = vector.shape_cast %101 : vector<1x64x64xf32> to vector<64x64xf32>
      %cst_60 = arith.constant dense<0.000000e+00> : vector<2x64xf32>
      %103 = tpu.matmul %100, %102, %cst_60 {dimension_numbers = #tpu.dot_dimension_numbers<[1], [0], [0], [1], [0, 0, 1, 1], [], []>} : vector<2x64xf32>, vector<64x64xf32>, vector<2x64xf32> -> vector<2x64xf32>
      %104 = arith.addf %98, %103 : vector<2x64xf32>
      %c1_61 = arith.constant 1 : index
      %c0_62 = arith.constant 0 : index
      %c0_63 = arith.constant 0 : index
      %105 = vector.load %arg7[%c1_61, %c0_62, %c0_63] : memref<2x1x64xf32, #tpu.memory_space<vmem>>, vector<1x1x64xf32>
      %106 = vector.shape_cast %105 : vector<1x1x64xf32> to vector<1x64xf32>
      %107 = vector.broadcast %106 : vector<1x64xf32> to vector<2x64xf32>
      %108 = arith.addf %104, %107 : vector<2x64xf32>
      %109 = math.tanh %108 : vector<2x64xf32>
      %c1_64 = arith.constant 1 : index
      %c0_65 = arith.constant 0 : index
      %c0_66 = arith.constant 0 : index
      %110 = vector.load %arg13[%c1_64, %c0_65, %c0_66] : memref<2x2x64xf32, #tpu.memory_space<vmem>>, vector<1x2x64xf32>
      %111 = vector.shape_cast %110 : vector<1x2x64xf32> to vector<2x64xf32>
      %112 = vector.shape_cast %109 : vector<2x64xf32> to vector<1x2x64xf32>
      tpu.vector_store %arg13[%c1_64, %c0_65, %c0_66], %112 {strides = array<i32>} : memref<2x2x64xf32, #tpu.memory_space<vmem>>, vector<1x2x64xf32>,
    } else {
    }
    %c1_20 = arith.constant 1 : index
    %c0_21 = arith.constant 0 : index
    %c0_22 = arith.constant 0 : index
    %33 = vector.load %arg13[%c1_20, %c0_21, %c0_22] : memref<2x2x64xf32, #tpu.memory_space<vmem>>, vector<1x2x64xf32>
    %34 = vector.shape_cast %33 : vector<1x2x64xf32> to vector<2x64xf32>
    %c0_23 = arith.constant 0 : index
    %c0_24 = arith.constant 0 : index
    %35 = vector.load %arg8[%c0_23, %c0_24] : memref<64x64xf32, #tpu.memory_space<vmem>>, vector<64x64xf32>
    %cst_25 = arith.constant dense<0.000000e+00> : vector<2x64xf32>
    %36 = tpu.matmul %34, %35, %cst_25 {dimension_numbers = #tpu.dot_dimension_numbers<[1], [0], [0], [1], [0, 0, 1, 1], [], []>} : vector<2x64xf32>, vector<64x64xf32>, vector<2x64xf32> -> vector<2x64xf32>
    %c0_26 = arith.constant 0 : index
    %c0_27 = arith.constant 0 : index
    %37 = vector.load %arg9[%c0_26, %c0_27] : memref<1x64xf32, #tpu.memory_space<vmem>>, vector<1x64xf32>
    %38 = vector.broadcast %37 : vector<1x64xf32> to vector<2x64xf32>
    %39 = arith.addf %36, %38 : vector<2x64xf32>
    %cst_28 = arith.constant 0.000000e+00 : f32
    %40 = vector.broadcast %cst_28 : f32 to vector<2x64xf32>
    %41 = arith.maximumf %39, %40 : vector<2x64xf32>
    %c0_29 = arith.constant 0 : index
    %c0_30 = arith.constant 0 : index
    %42 = vector.load %arg10[%c0_29, %c0_30] : memref<64x8xf32, #tpu.memory_space<vmem>>, vector<64x8xf32>
    %cst_31 = arith.constant dense<0.000000e+00> : vector<2x8xf32>
    %43 = tpu.matmul %41, %42, %cst_31 {dimension_numbers = #tpu.dot_dimension_numbers<[1], [0], [0], [1], [0, 0, 1, 1], [], []>} : vector<2x64xf32>, vector<64x8xf32>, vector<2x8xf32> -> vector<2x8xf32>
    %c0_32 = arith.constant 0 : index
    %c0_33 = arith.constant 0 : index
    %44 = vector.load %arg11[%c0_32, %c0_33] : memref<1x8xf32, #tpu.memory_space<vmem>>, vector<1x8xf32>
    %45 = vector.broadcast %44 : vector<1x8xf32> to vector<2x8xf32>
    %46 = arith.addf %43, %45 : vector<2x8xf32>
    %47 = vector.extract_strided_slice %46 {offsets = [0, 0], sizes = [2, 4], strides = [1, 1]} : vector<2x8xf32> to vector<2x4xf32>
    %cst_34 = arith.constant dense<0xFF800000> : vector<2xf32>
    %48 = vector.multi_reduction <maximumf>, %47, %cst_34 [1] : vector<2x4xf32> to vector<2xf32>
    %49 = vector.shape_cast %48 : vector<2xf32> to vector<2x1xf32>
    %50 = vector.broadcast %49 : vector<2x1xf32> to vector<2x4xf32>
    %51 = arith.subf %47, %50 : vector<2x4xf32>
    %52 = math.exp %51 : vector<2x4xf32>
    %cst_35 = arith.constant dense<0.000000e+00> : vector<2xf32>
    %53 = vector.multi_reduction <add>, %52, %cst_35 [1] : vector<2x4xf32> to vector<2xf32>
    %54 = vector.shape_cast %53 : vector<2xf32> to vector<2x1xf32>
    %55 = math.log %54 : vector<2x1xf32>
    %56 = arith.addf %49, %55 : vector<2x1xf32>
    %57 = vector.broadcast %56 : vector<2x1xf32> to vector<2x4xf32>
    %58 = arith.subf %47, %57 : vector<2x4xf32>
    %59 = vector.extract_strided_slice %46 {offsets = [0, 4], sizes = [2, 4], strides = [1, 1]} : vector<2x8xf32> to vector<2x4xf32>
    %cst_36 = arith.constant dense<0xFF800000> : vector<2xf32>
    %60 = vector.multi_reduction <maximumf>, %59, %cst_36 [1] : vector<2x4xf32> to vector<2xf32>
    %61 = vector.shape_cast %60 : vector<2xf32> to vector<2x1xf32>
    %62 = vector.broadcast %61 : vector<2x1xf32> to vector<2x4xf32>
    %63 = arith.subf %59, %62 : vector<2x4xf32>
    %64 = math.exp %63 : vector<2x4xf32>
    %cst_37 = arith.constant dense<0.000000e+00> : vector<2xf32>
    %65 = vector.multi_reduction <add>, %64, %cst_37 [1] : vector<2x4xf32> to vector<2xf32>
    %66 = vector.shape_cast %65 : vector<2xf32> to vector<2x1xf32>
    %67 = math.log %66 : vector<2x1xf32>
    %68 = arith.addf %61, %67 : vector<2x1xf32>
    %69 = vector.broadcast %68 : vector<2x1xf32> to vector<2x4xf32>
    %70 = arith.subf %59, %69 : vector<2x4xf32>
    %71 = tpu.concatenate %58, %70 in 1 : vector<2x4xf32>, vector<2x4xf32> -> vector<2x8xf32>
    %c0_38 = arith.constant 0 : index
    %c0_39 = arith.constant 0 : index
    %72 = vector.load %arg12[%c0_38, %c0_39] : memref<2x8xf32, #tpu.memory_space<vmem>>, vector<2x8xf32>
    tpu.vector_store %arg12[%c0_38, %c0_39], %71 {strides = array<i32>} : memref<2x8xf32, #tpu.memory_space<vmem>>, vector<2x8xf32>,
    return
  }
  func.func @transform_0(%arg0: i32, %arg1: memref<1xi32, #tpu.memory_space<smem>>) -> (i32, i32, i32) {
    %c0_i32 = arith.constant 0 : i32
    %c0_i32_0 = arith.constant 0 : i32
    %c0_i32_1 = arith.constant 0 : i32
    %c0_i32_2 = arith.constant 0 : i32
    return %c0_i32, %c0_i32_0, %c0_i32_1 : i32, i32, i32
  }
  func.func @transform_1(%arg0: i32, %arg1: memref<1xi32, #tpu.memory_space<smem>>) -> (i32, i32) {
    %c0_i32 = arith.constant 0 : i32
    %c0_i32_0 = arith.constant 0 : i32
    %c0_i32_1 = arith.constant 0 : i32
    return %c0_i32, %c0_i32_0 : i32, i32
  }
  func.func @transform_2(%arg0: i32, %arg1: memref<1xi32, #tpu.memory_space<smem>>) -> (i32, i32) {
    %c0_i32 = arith.constant 0 : i32
    %c0_i32_0 = arith.constant 0 : i32
    %c0_i32_1 = arith.constant 0 : i32
    return %c0_i32, %c0_i32_0 : i32, i32
  }
  func.func @transform_3(%arg0: i32, %arg1: memref<1xi32, #tpu.memory_space<smem>>) -> (i32, i32, i32) {
    %c0_i32 = arith.constant 0 : i32
    %c0_i32_0 = arith.constant 0 : i32
    %c0_i32_1 = arith.constant 0 : i32
    %c0_i32_2 = arith.constant 0 : i32
    return %c0_i32, %c0_i32_0, %c0_i32_1 : i32, i32, i32
  }
  func.func @transform_4(%arg0: i32, %arg1: memref<1xi32, #tpu.memory_space<smem>>) -> (i32, i32, i32) {
    %c0_i32 = arith.constant 0 : i32
    %c0_i32_0 = arith.constant 0 : i32
    %c0_i32_1 = arith.constant 0 : i32
    %c0_i32_2 = arith.constant 0 : i32
    return %c0_i32, %c0_i32_0, %c0_i32_1 : i32, i32, i32
  }
  func.func @transform_5(%arg0: i32, %arg1: memref<1xi32, #tpu.memory_space<smem>>) -> (i32, i32, i32) {
    %c0_i32 = arith.constant 0 : i32
    %c0_i32_0 = arith.constant 0 : i32
    %c0_i32_1 = arith.constant 0 : i32
    %c0_i32_2 = arith.constant 0 : i32
    return %c0_i32, %c0_i32_0, %c0_i32_1 : i32, i32, i32
  }
  func.func @transform_6(%arg0: i32, %arg1: memref<1xi32, #tpu.memory_space<smem>>) -> (i32, i32) {
    %c0_i32 = arith.constant 0 : i32
    %c0_i32_0 = arith.constant 0 : i32
    %c0_i32_1 = arith.constant 0 : i32
    return %c0_i32, %c0_i32_0 : i32, i32
  }
  func.func @transform_7(%arg0: i32, %arg1: memref<1xi32, #tpu.memory_space<smem>>) -> (i32, i32) {
    %c0_i32 = arith.constant 0 : i32
    %c0_i32_0 = arith.constant 0 : i32
    %c0_i32_1 = arith.constant 0 : i32
    return %c0_i32, %c0_i32_0 : i32, i32
  }
  func.func @transform_8(%arg0: i32, %arg1: memref<1xi32, #tpu.memory_space<smem>>) -> (i32, i32) {
    %c0_i32 = arith.constant 0 : i32
    %c0_i32_0 = arith.constant 0 : i32
    %c0_i32_1 = arith.constant 0 : i32
    return %c0_i32, %c0_i32_0 : i32, i32
  }
  func.func @transform_9(%arg0: i32, %arg1: memref<1xi32, #tpu.memory_space<smem>>) -> (i32, i32) {
    %c0_i32 = arith.constant 0 : i32
    %c0_i32_0 = arith.constant 0 : i32
    %c0_i32_1 = arith.constant 0 : i32
    return %c0_i32, %c0_i32_0 : i32, i32
  }
  func.func @transform_10(%arg0: i32, %arg1: memref<1xi32, #tpu.memory_space<smem>>) -> (i32, i32) {
    %c0_i32 = arith.constant 0 : i32
    %c0_i32_0 = arith.constant 0 : i32
    %c0_i32_1 = arith.constant 0 : i32
    return %c0_i32, %c0_i32_0 : i32, i32
  }
}

</mosaic_0001>

<bundles_post_ra>
// kernel: tpu_custom_call.1
= control target key start
LH: loop header
LB: loop body
LE: loop exit
PB: predicated region body
PF: predicated region fallthrough
CT: control target
= control target key end

     0   :  { %17 = vsyncpa [#allocation6], 0  ;;  %s4373_s0 = inlined_call_operand.<no memory space> [shape: s32[1], index: 0, kind: input, shape index: {}]   ;;  %s4374_s1 = inlined_call_operand.vmem [shape: f32[2,2,8], index: 1, kind: input, shape index: {}]   ;;  %s4375_s2 = inlined_call_operand.vmem [shape: f32[1,64], index: 2, kind: input, shape index: {}]   ;;  %s4376_s3 = inlined_call_operand.vmem [shape: f32[1,64], index: 3, kind: input, shape index: {}]   ;;  %s4377_s4 = inlined_call_operand.hbm [shape: f32[2,64,64], index: 4, kind: input, shape index: {}]   ;;  %s4378_s5 = inlined_call_operand.hbm [shape: f32[2,64,64], index: 5, kind: input, shape index: {}]   ;;  %s4379_s6 = inlined_call_operand.vmem [shape: f32[2,1,64], index: 6, kind: input, shape index: {}]   ;;  %s4380_s7 = inlined_call_operand.vmem [shape: f32[64,64], index: 7, kind: input, shape index: {}]   ;;  %s4381_s8 = inlined_call_operand.vmem [shape: f32[1,64], index: 8, kind: input, shape index: {}]   ;;  %s4382_s9 = inlined_call_operand.vmem [shape: f32[64,8], index: 9, kind: input, shape index: {}]   ;;  %s4383_s10 = inlined_call_operand.vmem [shape: f32[1,8], index: 10, kind: input, shape index: {}]   ;;  %s4384_s11 = inlined_call_operand.hbm [shape: f32[2,8], index: 11, kind: output, shape index: {}]  }
   0x1   :  { %18 = vsyncpa [#allocation9], 0 }
   0x2   :  { %19 = vsyncpa [#allocation7], 0  ;;  %s3913_s17 = smov [#allocation5]   ;;  %s3841_s21 = scalar_lea.hbm %s4377_s4, 2048 }
   0x3   :  { %s31_s18 = sshll.u32 %s3913_s17, 4  ;;  %p3842_p0 = scmp.ne.s32.totalorder %s4377_s4, %s3841_s21  ;;  %s32_s18 = int_to_ptr.vmem [resolvable:$true] %s31_s18 }
   0x4   :  { %p3845_p1 = scmp.lt.u32.totalorder %s3841_s21, %s4377_s4 }
   0x6   :  { %p3847_p2 = pnand %p3845_p1, %p3842_p0 }
   0x8   :  { %3850 = shalt.err (!%p3847_p2)
}
   0x9   :  { %s3851_s26 = scalar_lea.vmem %s32_s18, 2048  ;;  %p3856_p4 = scmp.lt.s32.totalorder %s32_s18, %s32_s18 }
   0xa   :  { %p3852_p3 = scmp.ne.s32.totalorder %s32_s18, %s3851_s26  ;;  %p3857_p5 = scmp.lt.s32.totalorder %s3851_s26, %s3851_s26 }
   0xc   :  { %p3858_p6 = por %p3857_p5, %p3856_p4 }
   0xe   :  { %p3859_p7 = pnand %p3858_p6, %p3852_p3 }
  0x10   :  { %3862 = shalt.err (!%p3859_p7)
}
  0x11   :  { %s3914_s27 = smov 128   ;;  %s3915_s28 = smov 8  }
  0x12   :  { %37 = dma.hbm_to_vmem [thread:$0]  %s4377_s4, 2048, %s32_s18, [#allocation6], %s3914_s27, %s3914_s27, %s3915_s28  }
  0x13   :  { %s3916_s12 = smov [#allocation8]   ;;  %s3863_s16 = scalar_lea.hbm %s4378_s5, 2048 }
  0x14   :  { %s43_s13 = sshll.u32 %s3916_s12, 4  ;;  %p3864_p8 = scmp.ne.s32.totalorder %s4378_s5, %s3863_s16  ;;  %s44_s13 = int_to_ptr.vmem [resolvable:$true] %s43_s13 }
  0x15   :  { %p3867_p9 = scmp.lt.u32.totalorder %s3863_s16, %s4378_s5 }
  0x17   :  { %p3869_p10 = pnand %p3867_p9, %p3864_p8 }
  0x19   :  { %3872 = shalt.err (!%p3869_p10)
}
  0x1a   :  { %s3873_s22 = scalar_lea.vmem %s44_s13, 2048  ;;  %p3878_p12 = scmp.lt.s32.totalorder %s44_s13, %s44_s13 }
  0x1b   :  { %p3874_p11 = scmp.ne.s32.totalorder %s44_s13, %s3873_s22  ;;  %p3879_p13 = scmp.lt.s32.totalorder %s3873_s22, %s3873_s22 }
  0x1d   :  { %p3880_p0 = por %p3879_p13, %p3878_p12 }
  0x1f   :  { %p3881_p1 = pnand %p3880_p0, %p3874_p11 }
  0x21   :  { %3884 = shalt.err (!%p3881_p1)
}
  0x22   :  { %49 = dma.hbm_to_vmem [thread:$0]  %s4378_s5, 2048, %s44_s13, [#allocation9], %s3914_s27, %s3914_s27, %s3915_s28  }
  0x23   :  { %3907 = dma.done.wait [#allocation6], 2048  }
  0x24   :  { %3908 = vsyncadd [#allocation6], 4294965248 }
  0x25   :  { %3909 = dma.done.wait [#allocation9], 2048  }
  0x26   :  { %3910 = vsyncadd [#allocation9], 4294965248  ;;  %vm72_vm0 = vcmask 517120   ;;  %v3917_v0 = vmov 0.0   ;;  %v4045_v1 = vld [vmem:[%s4374_s1] sm:$0x3] }
  0x27   :  { %73 = vst.msk [vmem:[#allocation2] sm:$0x3] %vm72_vm0, %v3917_v0  ;;  %74 = vst.msk [vmem:[#allocation2 + $0x2] sm:$0x3] %vm72_vm0, %v3917_v0  ;;  %v4050_v2 = vld [vmem:[%s4374_s1 + $0x2] sm:$0x3] }
  0x28   :  { %v4055_v3 = vld [vmem:[%s4375_s2] sm:$0x1]  ;;  %p2660_p2 = scmp.le.s32.totalorder %s4373_s0, 0 }
  0x29   :  { %v4060_v4 = vld [vmem:[%s4376_s3] sm:$0x1]  ;;  %v107_v5 = vld [vmem:[#allocation8] sm:$0xff] (!%p2660_p2)  ;;  %v108_v6 = vld [vmem:[#allocation8 + $0x8] sm:$0xff] (!%p2660_p2)  ;;  %v3918_v8 = vmov (!%p2660_p2), 0.0|0.0   ;;  %vm3919_vm1 = vmmov (!%p2660_p2), 0   ;;  %v85_v46 = vlaneseq (!%p2660_p2) }
  0x2a   :  { %78 = sbr.rel (%p2660_p2) target bundleno = 512 (0x200), region = 53  ;;  %v109_v7 = vld [vmem:[#allocation8 + $0x10] sm:$0xff] (!%p2660_p2)  ;;  %3440 = vmatprep.subr.bf16.mxu0 (!%p2660_p2), %v3918_v8  ;;  %v3441_v9 = vpack.c.bf16 (!%p2660_p2), %v108_v6, %v107_v5  ;;  %v110_v10 = vld [vmem:[#allocation8 + $0x18] sm:$0xff] (!%p2660_p2)  ;;  %v3920_v11 = vmov (!%p2660_p2), 0.0   ;;  %v3921_v12 = vmov (!%p2660_p2), 0   ;;  %3452 = vmatprep.subr.bf16.mxu1 (!%p2660_p2), %v3918_v8  ;;  %v111_v14 = vld [vmem:[#allocation8 + $0x20] sm:$0xff] (!%p2660_p2) }
  0x2b   :  { %2962 = vmatprep.mubr.msk.f32.mxu0 (!%p2660_p2), %vm3919_vm1, %v3920_v11  ;;  %3793 = vset.pattern.permute.xlu0 (!%p2660_p2), %v3921_v12  ;;  %v3444_v13 = vpack.c.bf16 (!%p2660_p2), %v110_v10, %v109_v7  ;;  %v112_v15 = vld [vmem:[#allocation8 + $0x28] sm:$0xff] (!%p2660_p2)  ;;  %v204_v17 = vld [vmem:[#allocation8 + $0x40] sm:$0xff] (!%p2660_p2)  ;;  %v113_v19 = vld [vmem:[#allocation8 + $0x30] sm:$0xff] (!%p2660_p2)  ;;  %vm115_vm2 = vcmask (!%p2660_p2), 523264   ;;  %v86_v47 = vshrl.u32 (!%p2660_p2), %v85_v46, 7  ;;  %vm97_vm3 = vcmask (!%p2660_p2), 261120  }
  0x2c   :  { %3442 = vmatpush3.bf16.msra.mxu0 (!%p2660_p2), %v3441_v9  ;;  %81 = vperm.xlu0 (!%p2660_p2), %3793, %v4045_v1   ;;  %v3447_v16 = vpack.c.bf16 (!%p2660_p2), %v112_v15, %v111_v14  ;;  %v205_v18 = vld [vmem:[#allocation8 + $0x48] sm:$0xff] (!%p2660_p2)  ;;  %v114_v20 = vld [vmem:[#allocation8 + $0x38] sm:$0xff] (!%p2660_p2)  ;;  %v193_v23 = vld [vmem:[#allocation5 + $0x40] sm:$0xff] (!%p2660_p2) }
  0x2d   :  { %3443 = vmatprep.subr.bf16.mxu0 (!%p2660_p2), %v3918_v8  ;;  %2981 = vmatprep.mubr.msk.f32.mxu1 (!%p2660_p2), %vm3919_vm1, %v3920_v11  ;;  %v3453_v21 = vpack.c.bf16 (!%p2660_p2), %v205_v18, %v204_v17  ;;  %v3450_v22 = vpack.c.bf16 (!%p2660_p2), %v114_v20, %v113_v19  ;;  %v194_v24 = vld [vmem:[#allocation5 + $0x48] sm:$0xff] (!%p2660_p2)  ;;  %v206_v27 = vld [vmem:[#allocation8 + $0x50] sm:$0xff] (!%p2660_p2)  ;;  %v207_v28 = vld [vmem:[#allocation8 + $0x58] sm:$0xff] (!%p2660_p2)  ;;  %v87_v49 = vsub.s32 (!%p2660_p2), 0, %v86_v47 }
  0x2e   :  { %v106_v25 = vld [vmem:[#allocation2] sm:$0x3] (!%p2660_p2)  ;;  %v3465_v26 = vpack.c.bf16 (!%p2660_p2), %v194_v24, %v193_v23  ;;  %v3456_v29 = vpack.c.bf16 (!%p2660_p2), %v207_v28, %v206_v27  ;;  %v195_v30 = vld [vmem:[#allocation5 + $0x50] sm:$0xff] (!%p2660_p2)  ;;  %v208_v33 = vld [vmem:[#allocation8 + $0x60] sm:$0xff] (!%p2660_p2) }
  0x2f   :  { %3454 = vmatpush3.bf16.msra.mxu1 (!%p2660_p2), %v3453_v21  ;;  %v196_v31 = vld [vmem:[#allocation5 + $0x58] sm:$0xff] (!%p2660_p2)  ;;  %v209_v34 = vld [vmem:[#allocation8 + $0x68] sm:$0xff] (!%p2660_p2)  ;;  %v197_v36 = vld [vmem:[#allocation5 + $0x60] sm:$0xff] (!%p2660_p2)  ;;  %v88_v50 = vrot.slane (!%p2660_p2), %v4055_v3, %v87_v49  ;;  %v103_v54 = vrot.slane (!%p2660_p2), %v4060_v4, %v87_v49 }
  0x30   :  { %3445 = vmatpush3.bf16.msra.mxu0 (!%p2660_p2), %v3444_v13  ;;  %93 = vperm.xlu0 (!%p2660_p2), %3793, %v4050_v2   ;;  %v3468_v32 = vpack.c.bf16 (!%p2660_p2), %v196_v31, %v195_v30  ;;  %v3459_v35 = vpack.c.bf16 (!%p2660_p2), %v209_v34, %v208_v33  ;;  %v198_v37 = vld [vmem:[#allocation5 + $0x68] sm:$0xff] (!%p2660_p2)  ;;  %v210_v39 = vld [vmem:[#allocation8 + $0x70] sm:$0xff] (!%p2660_p2)  ;;  %v211_v40 = vld [vmem:[#allocation8 + $0x78] sm:$0xff] (!%p2660_p2) }
  0x31   :  { %3446 = vmatprep.subr.bf16.mxu0 %v3918_v8  ;;  %3455 = vmatprep.subr.bf16.mxu1 %v3918_v8  ;;  %v3471_v38 = vpack.c.bf16 %v198_v37, %v197_v36  ;;  %v3462_v41 = vpack.c.bf16 %v211_v40, %v210_v39  ;;  %v199_v42 = vld [vmem:[#allocation5 + $0x70] sm:$0xff]  ;;  %v200_v43 = vld [vmem:[#allocation5 + $0x78] sm:$0xff] }
  0x32   :  { %v3474_v44 = vpack.c.bf16 %v200_v43, %v199_v42  ;;  %v202_v45 = vld [vmem:[#allocation2 + $0x2] sm:$0x3]  ;;  %v2665_v5 = vld [vmem:[%s4379_s6 + $0x1] ss:$0 sm:$0xff] }
  0x33   :  { %3457 = vmatpush3.bf16.msra.mxu1 %v3456_v29 }
  0x34   :  { %3448 = vmatpush3.bf16.msra.mxu0 %v3447_v16  ;;  %3458 = vmatprep.subr.bf16.mxu1 %v3918_v8 }
  0x35   :  { %3449 = vmatprep.subr.bf16.mxu0 %v3918_v8 }
  0x37   :  { %3460 = vmatpush3.bf16.msra.mxu1 %v3459_v35 }
  0x38   :  { %3451 = vmatpush3.bf16.msra.mxu0 %v3450_v22  ;;  %3461 = vmatprep.subr.bf16.mxu1 %v3918_v8 }
  0x39   :  { %3464 = vmatprep.subr.bf16.mxu0 %v3918_v8 }
  0x3b   :  { %2963 = vmatmul.mubr.msk.f32.vlgmr.msra.gmra.mrb[0].mxu0 %vm115_vm2, %v106_v25  ;;  %3463 = vmatpush3.bf16.msra.mxu1 %v3462_v41 }
  0x3c   :  { %3466 = vmatpush3.bf16.msra.mxu0 %v3465_v26  ;;  %3000 = vmatprep.mubr.msk.f32.mxu0 %vm3919_vm1, %v3920_v11 }
  0x3d   :  { %3467 = vmatprep.subr.bf16.mxu0 %v3918_v8 }
  0x3e   :  { %2982 = vmatmul.mubr.msk.f32.vlgmr.msra.gmra.mrb[0].mxu1 %vm115_vm2, %v202_v45 }
  0x40   :  { %3469 = vmatpush3.bf16.msra.mxu0 %v3468_v32 }
  0x41   :  { %3470 = vmatprep.subr.bf16.mxu0 %v3918_v8 }
  0x44   :  { %3472 = vmatpush3.bf16.msra.mxu0 %v3471_v38 }
  0x45   :  { %3473 = vmatprep.subr.bf16.mxu0 %v3918_v8 }
  0x48   :  { %3475 = vmatpush3.bf16.msra.mxu0 %v3474_v44 }
  0xab   :  { %v82_v48 = vpop.permute.xlu0 %81 }
  0xac   :  { %v90_v52 = vmul.f32 %v88_v50, %v82_v48 }
  0xaf   :  { %v94_v51 = vpop.permute.xlu0 %93 }
  0xb0   :  { %v96_v53 = vmul.f32 %v94_v51, %v88_v50 }
  0xb2   :  { %v98_v55 = vsel %vm97_vm3, %v90_v52, %v96_v53 }
  0xb3   :  { %v105_v56 = vadd.f32 %v103_v54, %v98_v55 }
 0x10e   :  { %v185_v57 = vpop.f32.mrb[0].mxu0 }
 0x10f   :  { %v189_v58 = vadd.f32 %v185_v57, %v105_v56  ;;  %v2964_v59 = vpop.f32.mrb[1].mxu0 }
 0x111   :  { %3794 = vtanh.f32 %v189_v58  ;;  %v281_v61 = vpop.f32.mrb[0].mxu1 }
 0x112   :  { %v2983_v62 = vpop.f32.mrb[1].mxu1 }
 0x11b   :  { %v3795_v60 = vpop.eup %3794 }
 0x11c   :  { %191 = vst.msk [vmem:[#allocation2] sm:$0x3] %vm72_vm0, %v3795_v60  ;;  %3001 = vmatmul.mubr.msk.f32.vlgmr.msra.gmra.mrb[2].mxu0 %vm115_vm2, %v3795_v60 }
 0x1ef   :  { %v354_v63 = vpop.f32.mrb[2].mxu0 }
 0x1f0   :  { %v355_v6 = vadd.f32 %v354_v63, %v281_v61  ;;  %v3002_v7 = vpop.f32.mrb[3].mxu0 }
 0x1f2   :  { %v366_v8 = vadd.f32 %v2665_v5, %v355_v6 }
 0x1f4   :  { %3796 = vtanh.f32 %v366_v8 }
 0x1fe   :  { %v3797_v9 = vpop.eup %3796 }
 0x1ff   :  { %368 = vst.msk [vmem:[#allocation2 + $0x2] sm:$0x3] %vm72_vm0, %v3797_v9 }
 0x200 PF:  { %p2666_p3 = scmp.le.s32.totalorder %s4373_s0, 1 }
 0x201   :  { %v401_v10 = vld [vmem:[#allocation8] sm:$0xff] (!%p2666_p3)  ;;  %v402_v11 = vld [vmem:[#allocation8 + $0x8] sm:$0xff] (!%p2666_p3)  ;;  %v403_v12 = vld [vmem:[#allocation8 + $0x10] sm:$0xff] (!%p2666_p3)  ;;  %v3922_v13 = vmov (!%p2666_p3), 0.0|0.0   ;;  %vm3923_vm4 = vmmov (!%p2666_p3), 0   ;;  %v3924_v16 = vmov (!%p2666_p3), 0.0   ;;  %v379_v51 = vlaneseq (!%p2666_p3) }
 0x202   :  { %372 = sbr.rel (%p2666_p3) target bundleno = 984 (0x3d8), region = 57  ;;  %3476 = vmatprep.subr.bf16.mxu0 (!%p2666_p3), %v3922_v13  ;;  %v3477_v14 = vpack.c.bf16 (!%p2666_p3), %v402_v11, %v401_v10  ;;  %v404_v15 = vld [vmem:[#allocation8 + $0x18] sm:$0xff] (!%p2666_p3)  ;;  %3019 = vmatprep.mubr.msk.f32.mxu0 (!%p2666_p3), %vm3923_vm4, %v3924_v16  ;;  %v3925_v17 = vmov (!%p2666_p3), 1   ;;  %v405_v19 = vld [vmem:[#allocation8 + $0x20] sm:$0xff] (!%p2666_p3)  ;;  %v406_v20 = vld [vmem:[#allocation8 + $0x28] sm:$0xff] (!%p2666_p3)  ;;  %vm409_vm5 = vcmask (!%p2666_p3), 523264  }
 0x203   :  { %3798 = vset.pattern.permute.xlu0 (!%p2666_p3), %v3925_v17  ;;  %3488 = vmatprep.subr.bf16.mxu1 (!%p2666_p3), %v3922_v13  ;;  %v3480_v18 = vpack.c.bf16 (!%p2666_p3), %v404_v15, %v403_v12  ;;  %v3483_v21 = vpack.c.bf16 (!%p2666_p3), %v406_v20, %v405_v19  ;;  %v498_v22 = vld [vmem:[#allocation8 + $0x40] sm:$0xff] (!%p2666_p3)  ;;  %v499_v23 = vld [vmem:[#allocation8 + $0x48] sm:$0xff] (!%p2666_p3)  ;;  %v407_v24 = vld [vmem:[#allocation8 + $0x30] sm:$0xff] (!%p2666_p3)  ;;  %v380_v52 = vshrl.u32 (!%p2666_p3), %v379_v51, 7  ;;  %vm391_vm6 = vcmask (!%p2666_p3), 261120  }
 0x204   :  { %3478 = vmatpush3.bf16.msra.mxu0 (!%p2666_p3), %v3477_v14  ;;  %375 = vperm.xlu0 (!%p2666_p3), %3798, %v4045_v1   ;;  %v408_v25 = vld [vmem:[#allocation8 + $0x38] sm:$0xff] (!%p2666_p3)  ;;  %v3489_v26 = vpack.c.bf16 (!%p2666_p3), %v499_v23, %v498_v22  ;;  %v487_v28 = vld [vmem:[#allocation5 + $0x40] sm:$0xff] (!%p2666_p3)  ;;  %v488_v29 = vld [vmem:[#allocation5 + $0x48] sm:$0xff] (!%p2666_p3) }
 0x205   :  { %3479 = vmatprep.subr.bf16.mxu0 (!%p2666_p3), %v3922_v13  ;;  %3038 = vmatprep.mubr.msk.f32.mxu1 (!%p2666_p3), %vm3923_vm4, %v3924_v16  ;;  %v3486_v27 = vpack.c.bf16 (!%p2666_p3), %v408_v25, %v407_v24  ;;  %v400_v30 = vld [vmem:[#allocation2] sm:$0x3] (!%p2666_p3)  ;;  %v3501_v31 = vpack.c.bf16 (!%p2666_p3), %v488_v29, %v487_v28  ;;  %v500_v32 = vld [vmem:[#allocation8 + $0x50] sm:$0xff] (!%p2666_p3)  ;;  %v502_v38 = vld [vmem:[#allocation8 + $0x60] sm:$0xff] (!%p2666_p3)  ;;  %v381_v54 = vsub.s32 (!%p2666_p3), 0, %v380_v52 }
 0x206   :  { %3490 = vmatpush3.bf16.msra.mxu1 (!%p2666_p3), %v3489_v26  ;;  %v501_v33 = vld [vmem:[#allocation8 + $0x58] sm:$0xff] (!%p2666_p3)  ;;  %v489_v35 = vld [vmem:[#allocation5 + $0x50] sm:$0xff] (!%p2666_p3)  ;;  %v503_v39 = vld [vmem:[#allocation8 + $0x68] sm:$0xff] (!%p2666_p3) }
 0x207   :  { %3491 = vmatprep.subr.bf16.mxu1 (!%p2666_p3), %v3922_v13  ;;  %v3492_v34 = vpack.c.bf16 (!%p2666_p3), %v501_v33, %v500_v32  ;;  %v490_v36 = vld [vmem:[#allocation5 + $0x58] sm:$0xff] (!%p2666_p3)  ;;  %v3495_v40 = vpack.c.bf16 (!%p2666_p3), %v503_v39, %v502_v38  ;;  %v491_v41 = vld [vmem:[#allocation5 + $0x60] sm:$0xff] (!%p2666_p3)  ;;  %v492_v42 = vld [vmem:[#allocation5 + $0x68] sm:$0xff] (!%p2666_p3)  ;;  %v382_v55 = vrot.slane (!%p2666_p3), %v4055_v3, %v381_v54  ;;  %v397_v59 = vrot.slane (!%p2666_p3), %v4060_v4, %v381_v54 }
 0x208   :  { %3481 = vmatpush3.bf16.msra.mxu0 (!%p2666_p3), %v3480_v18  ;;  %387 = vperm.xlu0 (!%p2666_p3), %3798, %v4050_v2   ;;  %v3504_v37 = vpack.c.bf16 (!%p2666_p3), %v490_v36, %v489_v35  ;;  %v3507_v43 = vpack.c.bf16 (!%p2666_p3), %v492_v42, %v491_v41  ;;  %v504_v44 = vld [vmem:[#allocation8 + $0x70] sm:$0xff] (!%p2666_p3)  ;;  %v505_v45 = vld [vmem:[#allocation8 + $0x78] sm:$0xff] (!%p2666_p3) }
 0x209   :  { %3482 = vmatprep.subr.bf16.mxu0 %v3922_v13  ;;  %v3498_v46 = vpack.c.bf16 %v505_v45, %v504_v44  ;;  %v493_v47 = vld [vmem:[#allocation5 + $0x70] sm:$0xff]  ;;  %v494_v48 = vld [vmem:[#allocation5 + $0x78] sm:$0xff] }
 0x20a   :  { %3493 = vmatpush3.bf16.msra.mxu1 %v3492_v34  ;;  %v3510_v49 = vpack.c.bf16 %v494_v48, %v493_v47  ;;  %v496_v50 = vld [vmem:[#allocation2 + $0x2] sm:$0x3]  ;;  %v2671_v10 = vld [vmem:[%s4379_s6 + $0x1] ss:$0 sm:$0xff] }
 0x20b   :  { %3494 = vmatprep.subr.bf16.mxu1 %v3922_v13 }
 0x20c   :  { %3484 = vmatpush3.bf16.msra.mxu0 %v3483_v21 }
 0x20d   :  { %3485 = vmatprep.subr.bf16.mxu0 %v3922_v13 }
 0x20e   :  { %3496 = vmatpush3.bf16.msra.mxu1 %v3495_v40 }
 0x20f   :  { %3497 = vmatprep.subr.bf16.mxu1 %v3922_v13 }
 0x210   :  { %3487 = vmatpush3.bf16.msra.mxu0 %v3486_v27 }
 0x211   :  { %3500 = vmatprep.subr.bf16.mxu0 %v3922_v13 }
 0x212   :  { %3499 = vmatpush3.bf16.msra.mxu1 %v3498_v46 }
 0x213   :  { %3020 = vmatmul.mubr.msk.f32.vlgmr.msra.gmra.mrb[0].mxu0 %vm409_vm5, %v400_v30 }
 0x214   :  { %3502 = vmatpush3.bf16.msra.mxu0 %v3501_v31  ;;  %3057 = vmatprep.mubr.msk.f32.mxu0 %vm3923_vm4, %v3924_v16 }
 0x215   :  { %3503 = vmatprep.subr.bf16.mxu0 %v3922_v13  ;;  %3039 = vmatmul.mubr.msk.f32.vlgmr.msra.gmra.mrb[0].mxu1 %vm409_vm5, %v496_v50 }
 0x218   :  { %3505 = vmatpush3.bf16.msra.mxu0 %v3504_v37 }
 0x219   :  { %3506 = vmatprep.subr.bf16.mxu0 %v3922_v13 }
 0x21c   :  { %3508 = vmatpush3.bf16.msra.mxu0 %v3507_v43 }
 0x21d   :  { %3509 = vmatprep.subr.bf16.mxu0 %v3922_v13 }
 0x220   :  { %3511 = vmatpush3.bf16.msra.mxu0 %v3510_v49 }
 0x283   :  { %v376_v53 = vpop.permute.xlu0 %375 }
 0x284   :  { %v384_v57 = vmul.f32 %v382_v55, %v376_v53 }
 0x287   :  { %v388_v56 = vpop.permute.xlu0 %387 }
 0x288   :  { %v390_v58 = vmul.f32 %v388_v56, %v382_v55 }
 0x28a   :  { %v392_v60 = vsel %vm391_vm6, %v384_v57, %v390_v58 }
 0x28b   :  { %v399_v61 = vadd.f32 %v397_v59, %v392_v60 }
 0x2e6   :  { %v479_v62 = vpop.f32.mrb[0].mxu0 }
 0x2e7   :  { %v483_v63 = vadd.f32 %v479_v62, %v399_v61  ;;  %v3021_v5 = vpop.f32.mrb[1].mxu0 }
 0x2e8   :  { %v575_v7 = vpop.f32.mrb[0].mxu1 }
 0x2e9   :  { %3799 = vtanh.f32 %v483_v63  ;;  %v3040_v8 = vpop.f32.mrb[1].mxu1 }
 0x2f3   :  { %v3800_v6 = vpop.eup %3799 }
 0x2f4   :  { %485 = vst.msk [vmem:[#allocation2] sm:$0x3] %vm72_vm0, %v3800_v6  ;;  %3058 = vmatmul.mubr.msk.f32.vlgmr.msra.gmra.mrb[2].mxu0 %vm409_vm5, %v3800_v6 }
 0x3c7   :  { %v648_v9 = vpop.f32.mrb[2].mxu0 }
 0x3c8   :  { %v649_v11 = vadd.f32 %v648_v9, %v575_v7  ;;  %v3059_v12 = vpop.f32.mrb[3].mxu0 }
 0x3ca   :  { %v660_v13 = vadd.f32 %v2671_v10, %v649_v11 }
 0x3cc   :  { %3801 = vtanh.f32 %v660_v13 }
 0x3d6   :  { %v3802_v14 = vpop.eup %3801 }
 0x3d7   :  { %662 = vst.msk [vmem:[#allocation2 + $0x2] sm:$0x3] %vm72_vm0, %v3802_v14 }
 0x3d8 PF:  { %p2672_p4 = scmp.le.s32.totalorder %s4373_s0, 2 }
 0x3d9   :  { %v695_v15 = vld [vmem:[#allocation8] sm:$0xff] (!%p2672_p4)  ;;  %v696_v16 = vld [vmem:[#allocation8 + $0x8] sm:$0xff] (!%p2672_p4)  ;;  %v697_v17 = vld [vmem:[#allocation8 + $0x10] sm:$0xff] (!%p2672_p4)  ;;  %v3926_v18 = vmov (!%p2672_p4), 0.0|0.0   ;;  %vm3927_vm7 = vmmov (!%p2672_p4), 0   ;;  %v3928_v21 = vmov (!%p2672_p4), 0.0   ;;  %v673_v56 = vlaneseq (!%p2672_p4) }
 0x3da   :  { %666 = sbr.rel (%p2672_p4) target bundleno = 1456 (0x5b0), region = 61  ;;  %3512 = vmatprep.subr.bf16.mxu0 (!%p2672_p4), %v3926_v18  ;;  %v3513_v19 = vpack.c.bf16 (!%p2672_p4), %v696_v16, %v695_v15  ;;  %v698_v20 = vld [vmem:[#allocation8 + $0x18] sm:$0xff] (!%p2672_p4)  ;;  %3076 = vmatprep.mubr.msk.f32.mxu0 (!%p2672_p4), %vm3927_vm7, %v3928_v21  ;;  %v3929_v22 = vmov (!%p2672_p4), 2   ;;  %v699_v24 = vld [vmem:[#allocation8 + $0x20] sm:$0xff] (!%p2672_p4)  ;;  %v700_v25 = vld [vmem:[#allocation8 + $0x28] sm:$0xff] (!%p2672_p4)  ;;  %vm703_vm8 = vcmask (!%p2672_p4), 523264  }
 0x3db   :  { %3803 = vset.pattern.permute.xlu0 (!%p2672_p4), %v3929_v22  ;;  %3524 = vmatprep.subr.bf16.mxu1 (!%p2672_p4), %v3926_v18  ;;  %v3516_v23 = vpack.c.bf16 (!%p2672_p4), %v698_v20, %v697_v17  ;;  %v3519_v26 = vpack.c.bf16 (!%p2672_p4), %v700_v25, %v699_v24  ;;  %v792_v27 = vld [vmem:[#allocation8 + $0x40] sm:$0xff] (!%p2672_p4)  ;;  %v793_v28 = vld [vmem:[#allocation8 + $0x48] sm:$0xff] (!%p2672_p4)  ;;  %v701_v29 = vld [vmem:[#allocation8 + $0x30] sm:$0xff] (!%p2672_p4)  ;;  %v674_v57 = vshrl.u32 (!%p2672_p4), %v673_v56, 7  ;;  %vm685_vm9 = vcmask (!%p2672_p4), 261120  }
 0x3dc   :  { %3514 = vmatpush3.bf16.msra.mxu0 (!%p2672_p4), %v3513_v19  ;;  %669 = vperm.xlu0 (!%p2672_p4), %3803, %v4045_v1   ;;  %v702_v30 = vld [vmem:[#allocation8 + $0x38] sm:$0xff] (!%p2672_p4)  ;;  %v3525_v31 = vpack.c.bf16 (!%p2672_p4), %v793_v28, %v792_v27  ;;  %v781_v33 = vld [vmem:[#allocation5 + $0x40] sm:$0xff] (!%p2672_p4)  ;;  %v782_v34 = vld [vmem:[#allocation5 + $0x48] sm:$0xff] (!%p2672_p4) }
 0x3dd   :  { %3515 = vmatprep.subr.bf16.mxu0 (!%p2672_p4), %v3926_v18  ;;  %3095 = vmatprep.mubr.msk.f32.mxu1 (!%p2672_p4), %vm3927_vm7, %v3928_v21  ;;  %v3522_v32 = vpack.c.bf16 (!%p2672_p4), %v702_v30, %v701_v29  ;;  %v694_v35 = vld [vmem:[#allocation2] sm:$0x3] (!%p2672_p4)  ;;  %v3537_v36 = vpack.c.bf16 (!%p2672_p4), %v782_v34, %v781_v33  ;;  %v794_v37 = vld [vmem:[#allocation8 + $0x50] sm:$0xff] (!%p2672_p4)  ;;  %v796_v43 = vld [vmem:[#allocation8 + $0x60] sm:$0xff] (!%p2672_p4)  ;;  %v675_v59 = vsub.s32 (!%p2672_p4), 0, %v674_v57 }
 0x3de   :  { %3526 = vmatpush3.bf16.msra.mxu1 (!%p2672_p4), %v3525_v31  ;;  %v795_v38 = vld [vmem:[#allocation8 + $0x58] sm:$0xff] (!%p2672_p4)  ;;  %v783_v40 = vld [vmem:[#allocation5 + $0x50] sm:$0xff] (!%p2672_p4)  ;;  %v797_v44 = vld [vmem:[#allocation8 + $0x68] sm:$0xff] (!%p2672_p4) }
 0x3df   :  { %3527 = vmatprep.subr.bf16.mxu1 (!%p2672_p4), %v3926_v18  ;;  %v3528_v39 = vpack.c.bf16 (!%p2672_p4), %v795_v38, %v794_v37  ;;  %v784_v41 = vld [vmem:[#allocation5 + $0x58] sm:$0xff] (!%p2672_p4)  ;;  %v3531_v45 = vpack.c.bf16 (!%p2672_p4), %v797_v44, %v796_v43  ;;  %v785_v46 = vld [vmem:[#allocation5 + $0x60] sm:$0xff] (!%p2672_p4)  ;;  %v786_v47 = vld [vmem:[#allocation5 + $0x68] sm:$0xff] (!%p2672_p4)  ;;  %v676_v60 = vrot.slane (!%p2672_p4), %v4055_v3, %v675_v59  ;;  %v691_v5 = vrot.slane (!%p2672_p4), %v4060_v4, %v675_v59 }
 0x3e0   :  { %3517 = vmatpush3.bf16.msra.mxu0 (!%p2672_p4), %v3516_v23  ;;  %681 = vperm.xlu0 (!%p2672_p4), %3803, %v4050_v2   ;;  %v3540_v42 = vpack.c.bf16 (!%p2672_p4), %v784_v41, %v783_v40  ;;  %v3543_v48 = vpack.c.bf16 (!%p2672_p4), %v786_v47, %v785_v46  ;;  %v798_v49 = vld [vmem:[#allocation8 + $0x70] sm:$0xff] (!%p2672_p4)  ;;  %v799_v50 = vld [vmem:[#allocation8 + $0x78] sm:$0xff] (!%p2672_p4) }
 0x3e1   :  { %3518 = vmatprep.subr.bf16.mxu0 %v3926_v18  ;;  %v3534_v51 = vpack.c.bf16 %v799_v50, %v798_v49  ;;  %v787_v52 = vld [vmem:[#allocation5 + $0x70] sm:$0xff]  ;;  %v788_v53 = vld [vmem:[#allocation5 + $0x78] sm:$0xff] }
 0x3e2   :  { %3529 = vmatpush3.bf16.msra.mxu1 %v3528_v39  ;;  %v3546_v54 = vpack.c.bf16 %v788_v53, %v787_v52  ;;  %v790_v55 = vld [vmem:[#allocation2 + $0x2] sm:$0x3]  ;;  %v2677_v15 = vld [vmem:[%s4379_s6 + $0x1] ss:$0 sm:$0xff] }
 0x3e3   :  { %3530 = vmatprep.subr.bf16.mxu1 %v3926_v18 }
 0x3e4   :  { %3520 = vmatpush3.bf16.msra.mxu0 %v3519_v26 }
 0x3e5   :  { %3521 = vmatprep.subr.bf16.mxu0 %v3926_v18 }
 0x3e6   :  { %3532 = vmatpush3.bf16.msra.mxu1 %v3531_v45 }
 0x3e7   :  { %3533 = vmatprep.subr.bf16.mxu1 %v3926_v18 }
 0x3e8   :  { %3523 = vmatpush3.bf16.msra.mxu0 %v3522_v32 }
 0x3e9   :  { %3536 = vmatprep.subr.bf16.mxu0 %v3926_v18 }
 0x3ea   :  { %3535 = vmatpush3.bf16.msra.mxu1 %v3534_v51 }
 0x3eb   :  { %3077 = vmatmul.mubr.msk.f32.vlgmr.msra.gmra.mrb[0].mxu0 %vm703_vm8, %v694_v35 }
 0x3ec   :  { %3538 = vmatpush3.bf16.msra.mxu0 %v3537_v36  ;;  %3114 = vmatprep.mubr.msk.f32.mxu0 %vm3927_vm7, %v3928_v21 }
 0x3ed   :  { %3539 = vmatprep.subr.bf16.mxu0 %v3926_v18  ;;  %3096 = vmatmul.mubr.msk.f32.vlgmr.msra.gmra.mrb[0].mxu1 %vm703_vm8, %v790_v55 }
 0x3f0   :  { %3541 = vmatpush3.bf16.msra.mxu0 %v3540_v42 }
 0x3f1   :  { %3542 = vmatprep.subr.bf16.mxu0 %v3926_v18 }
 0x3f4   :  { %3544 = vmatpush3.bf16.msra.mxu0 %v3543_v48 }
 0x3f5   :  { %3545 = vmatprep.subr.bf16.mxu0 %v3926_v18 }
 0x3f8   :  { %3547 = vmatpush3.bf16.msra.mxu0 %v3546_v54 }
 0x45b   :  { %v670_v58 = vpop.permute.xlu0 %669 }
 0x45c   :  { %v678_v62 = vmul.f32 %v676_v60, %v670_v58 }
 0x45f   :  { %v682_v61 = vpop.permute.xlu0 %681 }
 0x460   :  { %v684_v63 = vmul.f32 %v682_v61, %v676_v60 }
 0x462   :  { %v686_v6 = vsel %vm685_vm9, %v678_v62, %v684_v63 }
 0x463   :  { %v693_v7 = vadd.f32 %v691_v5, %v686_v6 }
 0x4be   :  { %v773_v8 = vpop.f32.mrb[0].mxu0 }
 0x4bf   :  { %v777_v9 = vadd.f32 %v773_v8, %v693_v7  ;;  %v3078_v10 = vpop.f32.mrb[1].mxu0 }
 0x4c0   :  { %v869_v12 = vpop.f32.mrb[0].mxu1 }
 0x4c1   :  { %3804 = vtanh.f32 %v777_v9  ;;  %v3097_v13 = vpop.f32.mrb[1].mxu1 }
 0x4cb   :  { %v3805_v11 = vpop.eup %3804 }
 0x4cc   :  { %779 = vst.msk [vmem:[#allocation2] sm:$0x3] %vm72_vm0, %v3805_v11  ;;  %3115 = vmatmul.mubr.msk.f32.vlgmr.msra.gmra.mrb[2].mxu0 %vm703_vm8, %v3805_v11 }
 0x59f   :  { %v942_v14 = vpop.f32.mrb[2].mxu0 }
 0x5a0   :  { %v943_v16 = vadd.f32 %v942_v14, %v869_v12  ;;  %v3116_v17 = vpop.f32.mrb[3].mxu0 }
 0x5a2   :  { %v954_v18 = vadd.f32 %v2677_v15, %v943_v16 }
 0x5a4   :  { %3806 = vtanh.f32 %v954_v18 }
 0x5ae   :  { %v3807_v19 = vpop.eup %3806 }
 0x5af   :  { %956 = vst.msk [vmem:[#allocation2 + $0x2] sm:$0x3] %vm72_vm0, %v3807_v19 }
 0x5b0 PF:  { %p2678_p5 = scmp.le.s32.totalorder %s4373_s0, 3 }
 0x5b1   :  { %v989_v20 = vld [vmem:[#allocation8] sm:$0xff] (!%p2678_p5)  ;;  %v990_v21 = vld [vmem:[#allocation8 + $0x8] sm:$0xff] (!%p2678_p5)  ;;  %v991_v22 = vld [vmem:[#allocation8 + $0x10] sm:$0xff] (!%p2678_p5)  ;;  %v3930_v23 = vmov (!%p2678_p5), 0.0|0.0   ;;  %vm3931_vm10 = vmmov (!%p2678_p5), 0   ;;  %v3932_v26 = vmov (!%p2678_p5), 0.0   ;;  %v967_v61 = vlaneseq (!%p2678_p5) }
 0x5b2   :  { %960 = sbr.rel (%p2678_p5) target bundleno = 1928 (0x788), region = 65  ;;  %3548 = vmatprep.subr.bf16.mxu0 (!%p2678_p5), %v3930_v23  ;;  %v3549_v24 = vpack.c.bf16 (!%p2678_p5), %v990_v21, %v989_v20  ;;  %v992_v25 = vld [vmem:[#allocation8 + $0x18] sm:$0xff] (!%p2678_p5)  ;;  %3133 = vmatprep.mubr.msk.f32.mxu0 (!%p2678_p5), %vm3931_vm10, %v3932_v26  ;;  %v3933_v27 = vmov (!%p2678_p5), 3   ;;  %v993_v29 = vld [vmem:[#allocation8 + $0x20] sm:$0xff] (!%p2678_p5)  ;;  %v994_v30 = vld [vmem:[#allocation8 + $0x28] sm:$0xff] (!%p2678_p5)  ;;  %vm997_vm11 = vcmask (!%p2678_p5), 523264  }
 0x5b3   :  { %3808 = vset.pattern.permute.xlu0 (!%p2678_p5), %v3933_v27  ;;  %3560 = vmatprep.subr.bf16.mxu1 (!%p2678_p5), %v3930_v23  ;;  %v3552_v28 = vpack.c.bf16 (!%p2678_p5), %v992_v25, %v991_v22  ;;  %v3555_v31 = vpack.c.bf16 (!%p2678_p5), %v994_v30, %v993_v29  ;;  %v1086_v32 = vld [vmem:[#allocation8 + $0x40] sm:$0xff] (!%p2678_p5)  ;;  %v1087_v33 = vld [vmem:[#allocation8 + $0x48] sm:$0xff] (!%p2678_p5)  ;;  %v995_v34 = vld [vmem:[#allocation8 + $0x30] sm:$0xff] (!%p2678_p5)  ;;  %v968_v62 = vshrl.u32 (!%p2678_p5), %v967_v61, 7  ;;  %vm979_vm12 = vcmask (!%p2678_p5), 261120  }
 0x5b4   :  { %3550 = vmatpush3.bf16.msra.mxu0 (!%p2678_p5), %v3549_v24  ;;  %963 = vperm.xlu0 (!%p2678_p5), %3808, %v4045_v1   ;;  %v996_v35 = vld [vmem:[#allocation8 + $0x38] sm:$0xff] (!%p2678_p5)  ;;  %v3561_v36 = vpack.c.bf16 (!%p2678_p5), %v1087_v33, %v1086_v32  ;;  %v1075_v38 = vld [vmem:[#allocation5 + $0x40] sm:$0xff] (!%p2678_p5)  ;;  %v1076_v39 = vld [vmem:[#allocation5 + $0x48] sm:$0xff] (!%p2678_p5) }
 0x5b5   :  { %3551 = vmatprep.subr.bf16.mxu0 (!%p2678_p5), %v3930_v23  ;;  %3152 = vmatprep.mubr.msk.f32.mxu1 (!%p2678_p5), %vm3931_vm10, %v3932_v26  ;;  %v3558_v37 = vpack.c.bf16 (!%p2678_p5), %v996_v35, %v995_v34  ;;  %v988_v40 = vld [vmem:[#allocation2] sm:$0x3] (!%p2678_p5)  ;;  %v3573_v41 = vpack.c.bf16 (!%p2678_p5), %v1076_v39, %v1075_v38  ;;  %v1088_v42 = vld [vmem:[#allocation8 + $0x50] sm:$0xff] (!%p2678_p5)  ;;  %v1090_v48 = vld [vmem:[#allocation8 + $0x60] sm:$0xff] (!%p2678_p5)  ;;  %v969_v5 = vsub.s32 (!%p2678_p5), 0, %v968_v62 }
 0x5b6   :  { %3562 = vmatpush3.bf16.msra.mxu1 (!%p2678_p5), %v3561_v36  ;;  %v1089_v43 = vld [vmem:[#allocation8 + $0x58] sm:$0xff] (!%p2678_p5)  ;;  %v1077_v45 = vld [vmem:[#allocation5 + $0x50] sm:$0xff] (!%p2678_p5)  ;;  %v1091_v49 = vld [vmem:[#allocation8 + $0x68] sm:$0xff] (!%p2678_p5) }
 0x5b7   :  { %3563 = vmatprep.subr.bf16.mxu1 (!%p2678_p5), %v3930_v23  ;;  %v3564_v44 = vpack.c.bf16 (!%p2678_p5), %v1089_v43, %v1088_v42  ;;  %v1078_v46 = vld [vmem:[#allocation5 + $0x58] sm:$0xff] (!%p2678_p5)  ;;  %v3567_v50 = vpack.c.bf16 (!%p2678_p5), %v1091_v49, %v1090_v48  ;;  %v1079_v51 = vld [vmem:[#allocation5 + $0x60] sm:$0xff] (!%p2678_p5)  ;;  %v1080_v52 = vld [vmem:[#allocation5 + $0x68] sm:$0xff] (!%p2678_p5)  ;;  %v970_v6 = vrot.slane (!%p2678_p5), %v4055_v3, %v969_v5  ;;  %v985_v10 = vrot.slane (!%p2678_p5), %v4060_v4, %v969_v5 }
 0x5b8   :  { %3553 = vmatpush3.bf16.msra.mxu0 (!%p2678_p5), %v3552_v28  ;;  %975 = vperm.xlu0 (!%p2678_p5), %3808, %v4050_v2   ;;  %v3576_v47 = vpack.c.bf16 (!%p2678_p5), %v1078_v46, %v1077_v45  ;;  %v3579_v53 = vpack.c.bf16 (!%p2678_p5), %v1080_v52, %v1079_v51  ;;  %v1092_v54 = vld [vmem:[#allocation8 + $0x70] sm:$0xff] (!%p2678_p5)  ;;  %v1093_v55 = vld [vmem:[#allocation8 + $0x78] sm:$0xff] (!%p2678_p5) }
 0x5b9   :  { %3554 = vmatprep.subr.bf16.mxu0 %v3930_v23  ;;  %v3570_v56 = vpack.c.bf16 %v1093_v55, %v1092_v54  ;;  %v1081_v57 = vld [vmem:[#allocation5 + $0x70] sm:$0xff]  ;;  %v1082_v58 = vld [vmem:[#allocation5 + $0x78] sm:$0xff] }
 0x5ba   :  { %3565 = vmatpush3.bf16.msra.mxu1 %v3564_v44  ;;  %v3582_v59 = vpack.c.bf16 %v1082_v58, %v1081_v57  ;;  %v1084_v60 = vld [vmem:[#allocation2 + $0x2] sm:$0x3]  ;;  %v2683_v20 = vld [vmem:[%s4379_s6 + $0x1] ss:$0 sm:$0xff] }
 0x5bb   :  { %3566 = vmatprep.subr.bf16.mxu1 %v3930_v23 }
 0x5bc   :  { %3556 = vmatpush3.bf16.msra.mxu0 %v3555_v31 }
 0x5bd   :  { %3557 = vmatprep.subr.bf16.mxu0 %v3930_v23 }
 0x5be   :  { %3568 = vmatpush3.bf16.msra.mxu1 %v3567_v50 }
 0x5bf   :  { %3569 = vmatprep.subr.bf16.mxu1 %v3930_v23 }
 0x5c0   :  { %3559 = vmatpush3.bf16.msra.mxu0 %v3558_v37 }
 0x5c1   :  { %3572 = vmatprep.subr.bf16.mxu0 %v3930_v23 }
 0x5c2   :  { %3571 = vmatpush3.bf16.msra.mxu1 %v3570_v56 }
 0x5c3   :  { %3134 = vmatmul.mubr.msk.f32.vlgmr.msra.gmra.mrb[0].mxu0 %vm997_vm11, %v988_v40 }
 0x5c4   :  { %3574 = vmatpush3.bf16.msra.mxu0 %v3573_v41  ;;  %3171 = vmatprep.mubr.msk.f32.mxu0 %vm3931_vm10, %v3932_v26 }
 0x5c5   :  { %3575 = vmatprep.subr.bf16.mxu0 %v3930_v23  ;;  %3153 = vmatmul.mubr.msk.f32.vlgmr.msra.gmra.mrb[0].mxu1 %vm997_vm11, %v1084_v60 }
 0x5c8   :  { %3577 = vmatpush3.bf16.msra.mxu0 %v3576_v47 }
 0x5c9   :  { %3578 = vmatprep.subr.bf16.mxu0 %v3930_v23 }
 0x5cc   :  { %3580 = vmatpush3.bf16.msra.mxu0 %v3579_v53 }
 0x5cd   :  { %3581 = vmatprep.subr.bf16.mxu0 %v3930_v23 }
 0x5d0   :  { %3583 = vmatpush3.bf16.msra.mxu0 %v3582_v59 }
 0x633   :  { %v964_v63 = vpop.permute.xlu0 %963 }
 0x634   :  { %v972_v8 = vmul.f32 %v970_v6, %v964_v63 }
 0x637   :  { %v976_v7 = vpop.permute.xlu0 %975 }
 0x638   :  { %v978_v9 = vmul.f32 %v976_v7, %v970_v6 }
 0x63a   :  { %v980_v11 = vsel %vm979_vm12, %v972_v8, %v978_v9 }
 0x63b   :  { %v987_v12 = vadd.f32 %v985_v10, %v980_v11 }
 0x696   :  { %v1067_v13 = vpop.f32.mrb[0].mxu0 }
 0x697   :  { %v1071_v14 = vadd.f32 %v1067_v13, %v987_v12  ;;  %v3135_v15 = vpop.f32.mrb[1].mxu0 }
 0x698   :  { %v1163_v17 = vpop.f32.mrb[0].mxu1 }
 0x699   :  { %3809 = vtanh.f32 %v1071_v14  ;;  %v3154_v18 = vpop.f32.mrb[1].mxu1 }
 0x6a3   :  { %v3810_v16 = vpop.eup %3809 }
 0x6a4   :  { %1073 = vst.msk [vmem:[#allocation2] sm:$0x3] %vm72_vm0, %v3810_v16  ;;  %3172 = vmatmul.mubr.msk.f32.vlgmr.msra.gmra.mrb[2].mxu0 %vm997_vm11, %v3810_v16 }
 0x777   :  { %v1236_v19 = vpop.f32.mrb[2].mxu0 }
 0x778   :  { %v1237_v21 = vadd.f32 %v1236_v19, %v1163_v17  ;;  %v3173_v22 = vpop.f32.mrb[3].mxu0 }
 0x77a   :  { %v1248_v23 = vadd.f32 %v2683_v20, %v1237_v21 }
 0x77c   :  { %3811 = vtanh.f32 %v1248_v23 }
 0x786   :  { %v3812_v24 = vpop.eup %3811 }
 0x787   :  { %1250 = vst.msk [vmem:[#allocation2 + $0x2] sm:$0x3] %vm72_vm0, %v3812_v24 }
 0x788 PF:  { %p2684_p6 = scmp.le.s32.totalorder %s4373_s0, 4 }
 0x789   :  { %v1283_v25 = vld [vmem:[#allocation8] sm:$0xff] (!%p2684_p6)  ;;  %v1284_v26 = vld [vmem:[#allocation8 + $0x8] sm:$0xff] (!%p2684_p6)  ;;  %v1285_v27 = vld [vmem:[#allocation8 + $0x10] sm:$0xff] (!%p2684_p6)  ;;  %v3934_v28 = vmov (!%p2684_p6), 0.0|0.0   ;;  %vm3935_vm13 = vmmov (!%p2684_p6), 0   ;;  %v3936_v31 = vmov (!%p2684_p6), 0.0   ;;  %v1261_v7 = vlaneseq (!%p2684_p6) }
 0x78a   :  { %1254 = sbr.rel (%p2684_p6) target bundleno = 2400 (0x960), region = 69  ;;  %3584 = vmatprep.subr.bf16.mxu0 (!%p2684_p6), %v3934_v28  ;;  %v3585_v29 = vpack.c.bf16 (!%p2684_p6), %v1284_v26, %v1283_v25  ;;  %v1286_v30 = vld [vmem:[#allocation8 + $0x18] sm:$0xff] (!%p2684_p6)  ;;  %3190 = vmatprep.mubr.msk.f32.mxu0 (!%p2684_p6), %vm3935_vm13, %v3936_v31  ;;  %v3937_v32 = vmov (!%p2684_p6), 4   ;;  %v1287_v34 = vld [vmem:[#allocation8 + $0x20] sm:$0xff] (!%p2684_p6)  ;;  %v1288_v35 = vld [vmem:[#allocation8 + $0x28] sm:$0xff] (!%p2684_p6)  ;;  %vm1291_vm14 = vcmask (!%p2684_p6), 523264  }
 0x78b   :  { %3813 = vset.pattern.permute.xlu0 (!%p2684_p6), %v3937_v32  ;;  %3596 = vmatprep.subr.bf16.mxu1 (!%p2684_p6), %v3934_v28  ;;  %v3588_v33 = vpack.c.bf16 (!%p2684_p6), %v1286_v30, %v1285_v27  ;;  %v3591_v36 = vpack.c.bf16 (!%p2684_p6), %v1288_v35, %v1287_v34  ;;  %v1380_v37 = vld [vmem:[#allocation8 + $0x40] sm:$0xff] (!%p2684_p6)  ;;  %v1381_v38 = vld [vmem:[#allocation8 + $0x48] sm:$0xff] (!%p2684_p6)  ;;  %v1289_v39 = vld [vmem:[#allocation8 + $0x30] sm:$0xff] (!%p2684_p6)  ;;  %v1262_v8 = vshrl.u32 (!%p2684_p6), %v1261_v7, 7  ;;  %vm1273_vm15 = vcmask (!%p2684_p6), 261120  }
 0x78c   :  { %3586 = vmatpush3.bf16.msra.mxu0 (!%p2684_p6), %v3585_v29  ;;  %1257 = vperm.xlu0 (!%p2684_p6), %3813, %v4045_v1   ;;  %v1290_v40 = vld [vmem:[#allocation8 + $0x38] sm:$0xff] (!%p2684_p6)  ;;  %v3597_v41 = vpack.c.bf16 (!%p2684_p6), %v1381_v38, %v1380_v37  ;;  %v1369_v43 = vld [vmem:[#allocation5 + $0x40] sm:$0xff] (!%p2684_p6)  ;;  %v1370_v44 = vld [vmem:[#allocation5 + $0x48] sm:$0xff] (!%p2684_p6) }
 0x78d   :  { %3587 = vmatprep.subr.bf16.mxu0 (!%p2684_p6), %v3934_v28  ;;  %3209 = vmatprep.mubr.msk.f32.mxu1 (!%p2684_p6), %vm3935_vm13, %v3936_v31  ;;  %v3594_v42 = vpack.c.bf16 (!%p2684_p6), %v1290_v40, %v1289_v39  ;;  %v1282_v45 = vld [vmem:[#allocation2] sm:$0x3] (!%p2684_p6)  ;;  %v3609_v46 = vpack.c.bf16 (!%p2684_p6), %v1370_v44, %v1369_v43  ;;  %v1382_v47 = vld [vmem:[#allocation8 + $0x50] sm:$0xff] (!%p2684_p6)  ;;  %v1384_v53 = vld [vmem:[#allocation8 + $0x60] sm:$0xff] (!%p2684_p6)  ;;  %v1263_v10 = vsub.s32 (!%p2684_p6), 0, %v1262_v8 }
 0x78e   :  { %3598 = vmatpush3.bf16.msra.mxu1 (!%p2684_p6), %v3597_v41  ;;  %v1383_v48 = vld [vmem:[#allocation8 + $0x58] sm:$0xff] (!%p2684_p6)  ;;  %v1371_v50 = vld [vmem:[#allocation5 + $0x50] sm:$0xff] (!%p2684_p6)  ;;  %v1385_v54 = vld [vmem:[#allocation8 + $0x68] sm:$0xff] (!%p2684_p6) }
 0x78f   :  { %3599 = vmatprep.subr.bf16.mxu1 (!%p2684_p6), %v3934_v28  ;;  %v3600_v49 = vpack.c.bf16 (!%p2684_p6), %v1383_v48, %v1382_v47  ;;  %v1372_v51 = vld [vmem:[#allocation5 + $0x58] sm:$0xff] (!%p2684_p6)  ;;  %v3603_v55 = vpack.c.bf16 (!%p2684_p6), %v1385_v54, %v1384_v53  ;;  %v1373_v56 = vld [vmem:[#allocation5 + $0x60] sm:$0xff] (!%p2684_p6)  ;;  %v1374_v57 = vld [vmem:[#allocation5 + $0x68] sm:$0xff] (!%p2684_p6)  ;;  %v1264_v11 = vrot.slane (!%p2684_p6), %v4055_v3, %v1263_v10  ;;  %v1279_v15 = vrot.slane (!%p2684_p6), %v4060_v4, %v1263_v10 }
 0x790   :  { %3589 = vmatpush3.bf16.msra.mxu0 (!%p2684_p6), %v3588_v33  ;;  %1269 = vperm.xlu0 (!%p2684_p6), %3813, %v4050_v2   ;;  %v3612_v52 = vpack.c.bf16 (!%p2684_p6), %v1372_v51, %v1371_v50  ;;  %v3615_v58 = vpack.c.bf16 (!%p2684_p6), %v1374_v57, %v1373_v56  ;;  %v1386_v59 = vld [vmem:[#allocation8 + $0x70] sm:$0xff] (!%p2684_p6)  ;;  %v1387_v60 = vld [vmem:[#allocation8 + $0x78] sm:$0xff] (!%p2684_p6) }
 0x791   :  { %3590 = vmatprep.subr.bf16.mxu0 %v3934_v28  ;;  %v3606_v61 = vpack.c.bf16 %v1387_v60, %v1386_v59  ;;  %v1375_v62 = vld [vmem:[#allocation5 + $0x70] sm:$0xff]  ;;  %v1376_v63 = vld [vmem:[#allocation5 + $0x78] sm:$0xff] }
 0x792   :  { %3601 = vmatpush3.bf16.msra.mxu1 %v3600_v49  ;;  %v3618_v5 = vpack.c.bf16 %v1376_v63, %v1375_v62  ;;  %v1378_v6 = vld [vmem:[#allocation2 + $0x2] sm:$0x3]  ;;  %v2689_v25 = vld [vmem:[%s4379_s6 + $0x1] ss:$0 sm:$0xff] }
 0x793   :  { %3602 = vmatprep.subr.bf16.mxu1 %v3934_v28 }
 0x794   :  { %3592 = vmatpush3.bf16.msra.mxu0 %v3591_v36 }
 0x795   :  { %3593 = vmatprep.subr.bf16.mxu0 %v3934_v28 }
 0x796   :  { %3604 = vmatpush3.bf16.msra.mxu1 %v3603_v55 }
 0x797   :  { %3605 = vmatprep.subr.bf16.mxu1 %v3934_v28 }
 0x798   :  { %3595 = vmatpush3.bf16.msra.mxu0 %v3594_v42 }
 0x799   :  { %3608 = vmatprep.subr.bf16.mxu0 %v3934_v28 }
 0x79a   :  { %3607 = vmatpush3.bf16.msra.mxu1 %v3606_v61 }
 0x79b   :  { %3191 = vmatmul.mubr.msk.f32.vlgmr.msra.gmra.mrb[0].mxu0 %vm1291_vm14, %v1282_v45 }
 0x79c   :  { %3610 = vmatpush3.bf16.msra.mxu0 %v3609_v46  ;;  %3228 = vmatprep.mubr.msk.f32.mxu0 %vm3935_vm13, %v3936_v31 }
 0x79d   :  { %3611 = vmatprep.subr.bf16.mxu0 %v3934_v28  ;;  %3210 = vmatmul.mubr.msk.f32.vlgmr.msra.gmra.mrb[0].mxu1 %vm1291_vm14, %v1378_v6 }
 0x7a0   :  { %3613 = vmatpush3.bf16.msra.mxu0 %v3612_v52 }
 0x7a1   :  { %3614 = vmatprep.subr.bf16.mxu0 %v3934_v28 }
 0x7a4   :  { %3616 = vmatpush3.bf16.msra.mxu0 %v3615_v58 }
 0x7a5   :  { %3617 = vmatprep.subr.bf16.mxu0 %v3934_v28 }
 0x7a8   :  { %3619 = vmatpush3.bf16.msra.mxu0 %v3618_v5 }
 0x80b   :  { %v1258_v9 = vpop.permute.xlu0 %1257 }
 0x80c   :  { %v1266_v13 = vmul.f32 %v1264_v11, %v1258_v9 }
 0x80f   :  { %v1270_v12 = vpop.permute.xlu0 %1269 }
 0x810   :  { %v1272_v14 = vmul.f32 %v1270_v12, %v1264_v11 }
 0x812   :  { %v1274_v16 = vsel %vm1273_vm15, %v1266_v13, %v1272_v14 }
 0x813   :  { %v1281_v17 = vadd.f32 %v1279_v15, %v1274_v16 }
 0x86e   :  { %v1361_v18 = vpop.f32.mrb[0].mxu0 }
 0x86f   :  { %v1365_v19 = vadd.f32 %v1361_v18, %v1281_v17  ;;  %v3192_v20 = vpop.f32.mrb[1].mxu0 }
 0x870   :  { %v1457_v22 = vpop.f32.mrb[0].mxu1 }
 0x871   :  { %3814 = vtanh.f32 %v1365_v19  ;;  %v3211_v23 = vpop.f32.mrb[1].mxu1 }
 0x87b   :  { %v3815_v21 = vpop.eup %3814 }
 0x87c   :  { %1367 = vst.msk [vmem:[#allocation2] sm:$0x3] %vm72_vm0, %v3815_v21  ;;  %3229 = vmatmul.mubr.msk.f32.vlgmr.msra.gmra.mrb[2].mxu0 %vm1291_vm14, %v3815_v21 }
 0x94f   :  { %v1530_v24 = vpop.f32.mrb[2].mxu0 }
 0x950   :  { %v1531_v26 = vadd.f32 %v1530_v24, %v1457_v22  ;;  %v3230_v27 = vpop.f32.mrb[3].mxu0 }
 0x952   :  { %v1542_v28 = vadd.f32 %v2689_v25, %v1531_v26 }
 0x954   :  { %3816 = vtanh.f32 %v1542_v28 }
 0x95e   :  { %v3817_v29 = vpop.eup %3816 }
 0x95f   :  { %1544 = vst.msk [vmem:[#allocation2 + $0x2] sm:$0x3] %vm72_vm0, %v3817_v29 }
 0x960 PF:  { %p2690_p7 = scmp.le.s32.totalorder %s4373_s0, 5 }
 0x961   :  { %v1577_v30 = vld [vmem:[#allocation8] sm:$0xff] (!%p2690_p7)  ;;  %v1578_v31 = vld [vmem:[#allocation8 + $0x8] sm:$0xff] (!%p2690_p7)  ;;  %v1579_v32 = vld [vmem:[#allocation8 + $0x10] sm:$0xff] (!%p2690_p7)  ;;  %v3938_v33 = vmov (!%p2690_p7), 0.0|0.0   ;;  %vm3939_vm1 = vmmov (!%p2690_p7), 0   ;;  %v3940_v36 = vmov (!%p2690_p7), 0.0   ;;  %v1555_v12 = vlaneseq (!%p2690_p7) }
 0x962   :  { %1548 = sbr.rel (%p2690_p7) target bundleno = 2872 (0xb38), region = 73  ;;  %3620 = vmatprep.subr.bf16.mxu0 (!%p2690_p7), %v3938_v33  ;;  %v3621_v34 = vpack.c.bf16 (!%p2690_p7), %v1578_v31, %v1577_v30  ;;  %v1580_v35 = vld [vmem:[#allocation8 + $0x18] sm:$0xff] (!%p2690_p7)  ;;  %3247 = vmatprep.mubr.msk.f32.mxu0 (!%p2690_p7), %vm3939_vm1, %v3940_v36  ;;  %v3941_v37 = vmov (!%p2690_p7), 5   ;;  %v1581_v39 = vld [vmem:[#allocation8 + $0x20] sm:$0xff] (!%p2690_p7)  ;;  %v1582_v40 = vld [vmem:[#allocation8 + $0x28] sm:$0xff] (!%p2690_p7)  ;;  %vm1585_vm2 = vcmask (!%p2690_p7), 523264  }
 0x963   :  { %3818 = vset.pattern.permute.xlu0 (!%p2690_p7), %v3941_v37  ;;  %3632 = vmatprep.subr.bf16.mxu1 (!%p2690_p7), %v3938_v33  ;;  %v3624_v38 = vpack.c.bf16 (!%p2690_p7), %v1580_v35, %v1579_v32  ;;  %v3627_v41 = vpack.c.bf16 (!%p2690_p7), %v1582_v40, %v1581_v39  ;;  %v1674_v42 = vld [vmem:[#allocation8 + $0x40] sm:$0xff] (!%p2690_p7)  ;;  %v1675_v43 = vld [vmem:[#allocation8 + $0x48] sm:$0xff] (!%p2690_p7)  ;;  %v1583_v44 = vld [vmem:[#allocation8 + $0x30] sm:$0xff] (!%p2690_p7)  ;;  %v1556_v13 = vshrl.u32 (!%p2690_p7), %v1555_v12, 7  ;;  %vm1567_vm3 = vcmask (!%p2690_p7), 261120  }
 0x964   :  { %3622 = vmatpush3.bf16.msra.mxu0 (!%p2690_p7), %v3621_v34  ;;  %1551 = vperm.xlu0 (!%p2690_p7), %3818, %v4045_v1   ;;  %v1584_v45 = vld [vmem:[#allocation8 + $0x38] sm:$0xff] (!%p2690_p7)  ;;  %v3633_v46 = vpack.c.bf16 (!%p2690_p7), %v1675_v43, %v1674_v42  ;;  %v1663_v48 = vld [vmem:[#allocation5 + $0x40] sm:$0xff] (!%p2690_p7)  ;;  %v1664_v49 = vld [vmem:[#allocation5 + $0x48] sm:$0xff] (!%p2690_p7) }
 0x965   :  { %3623 = vmatprep.subr.bf16.mxu0 (!%p2690_p7), %v3938_v33  ;;  %3266 = vmatprep.mubr.msk.f32.mxu1 (!%p2690_p7), %vm3939_vm1, %v3940_v36  ;;  %v3630_v47 = vpack.c.bf16 (!%p2690_p7), %v1584_v45, %v1583_v44  ;;  %v1576_v50 = vld [vmem:[#allocation2] sm:$0x3] (!%p2690_p7)  ;;  %v3645_v51 = vpack.c.bf16 (!%p2690_p7), %v1664_v49, %v1663_v48  ;;  %v1676_v52 = vld [vmem:[#allocation8 + $0x50] sm:$0xff] (!%p2690_p7)  ;;  %v1678_v58 = vld [vmem:[#allocation8 + $0x60] sm:$0xff] (!%p2690_p7)  ;;  %v1557_v15 = vsub.s32 (!%p2690_p7), 0, %v1556_v13 }
 0x966   :  { %3634 = vmatpush3.bf16.msra.mxu1 (!%p2690_p7), %v3633_v46  ;;  %v1677_v53 = vld [vmem:[#allocation8 + $0x58] sm:$0xff] (!%p2690_p7)  ;;  %v1665_v55 = vld [vmem:[#allocation5 + $0x50] sm:$0xff] (!%p2690_p7)  ;;  %v1679_v59 = vld [vmem:[#allocation8 + $0x68] sm:$0xff] (!%p2690_p7) }
 0x967   :  { %3635 = vmatprep.subr.bf16.mxu1 (!%p2690_p7), %v3938_v33  ;;  %v3636_v54 = vpack.c.bf16 (!%p2690_p7), %v1677_v53, %v1676_v52  ;;  %v1666_v56 = vld [vmem:[#allocation5 + $0x58] sm:$0xff] (!%p2690_p7)  ;;  %v3639_v60 = vpack.c.bf16 (!%p2690_p7), %v1679_v59, %v1678_v58  ;;  %v1667_v61 = vld [vmem:[#allocation5 + $0x60] sm:$0xff] (!%p2690_p7)  ;;  %v1668_v62 = vld [vmem:[#allocation5 + $0x68] sm:$0xff] (!%p2690_p7)  ;;  %v1558_v16 = vrot.slane (!%p2690_p7), %v4055_v3, %v1557_v15  ;;  %v1573_v20 = vrot.slane (!%p2690_p7), %v4060_v4, %v1557_v15 }
 0x968   :  { %3625 = vmatpush3.bf16.msra.mxu0 (!%p2690_p7), %v3624_v38  ;;  %1563 = vperm.xlu0 (!%p2690_p7), %3818, %v4050_v2   ;;  %v3648_v57 = vpack.c.bf16 (!%p2690_p7), %v1666_v56, %v1665_v55  ;;  %v3651_v63 = vpack.c.bf16 (!%p2690_p7), %v1668_v62, %v1667_v61  ;;  %v1680_v5 = vld [vmem:[#allocation8 + $0x70] sm:$0xff] (!%p2690_p7)  ;;  %v1681_v6 = vld [vmem:[#allocation8 + $0x78] sm:$0xff] (!%p2690_p7) }
 0x969   :  { %3626 = vmatprep.subr.bf16.mxu0 %v3938_v33  ;;  %v3642_v7 = vpack.c.bf16 %v1681_v6, %v1680_v5  ;;  %v1669_v8 = vld [vmem:[#allocation5 + $0x70] sm:$0xff]  ;;  %v1670_v9 = vld [vmem:[#allocation5 + $0x78] sm:$0xff] }
 0x96a   :  { %3637 = vmatpush3.bf16.msra.mxu1 %v3636_v54  ;;  %v3654_v10 = vpack.c.bf16 %v1670_v9, %v1669_v8  ;;  %v1672_v11 = vld [vmem:[#allocation2 + $0x2] sm:$0x3]  ;;  %v2695_v30 = vld [vmem:[%s4379_s6 + $0x1] ss:$0 sm:$0xff] }
 0x96b   :  { %3638 = vmatprep.subr.bf16.mxu1 %v3938_v33 }
 0x96c   :  { %3628 = vmatpush3.bf16.msra.mxu0 %v3627_v41 }
 0x96d   :  { %3629 = vmatprep.subr.bf16.mxu0 %v3938_v33 }
 0x96e   :  { %3640 = vmatpush3.bf16.msra.mxu1 %v3639_v60 }
 0x96f   :  { %3641 = vmatprep.subr.bf16.mxu1 %v3938_v33 }
 0x970   :  { %3631 = vmatpush3.bf16.msra.mxu0 %v3630_v47 }
 0x971   :  { %3644 = vmatprep.subr.bf16.mxu0 %v3938_v33 }
 0x972   :  { %3643 = vmatpush3.bf16.msra.mxu1 %v3642_v7 }
 0x973   :  { %3248 = vmatmul.mubr.msk.f32.vlgmr.msra.gmra.mrb[0].mxu0 %vm1585_vm2, %v1576_v50 }
 0x974   :  { %3646 = vmatpush3.bf16.msra.mxu0 %v3645_v51  ;;  %3285 = vmatprep.mubr.msk.f32.mxu0 %vm3939_vm1, %v3940_v36 }
 0x975   :  { %3647 = vmatprep.subr.bf16.mxu0 %v3938_v33  ;;  %3267 = vmatmul.mubr.msk.f32.vlgmr.msra.gmra.mrb[0].mxu1 %vm1585_vm2, %v1672_v11 }
 0x978   :  { %3649 = vmatpush3.bf16.msra.mxu0 %v3648_v57 }
 0x979   :  { %3650 = vmatprep.subr.bf16.mxu0 %v3938_v33 }
 0x97c   :  { %3652 = vmatpush3.bf16.msra.mxu0 %v3651_v63 }
 0x97d   :  { %3653 = vmatprep.subr.bf16.mxu0 %v3938_v33 }
 0x980   :  { %3655 = vmatpush3.bf16.msra.mxu0 %v3654_v10 }
 0x9e3   :  { %v1552_v14 = vpop.permute.xlu0 %1551 }
 0x9e4   :  { %v1560_v18 = vmul.f32 %v1558_v16, %v1552_v14 }
 0x9e7   :  { %v1564_v17 = vpop.permute.xlu0 %1563 }
 0x9e8   :  { %v1566_v19 = vmul.f32 %v1564_v17, %v1558_v16 }
 0x9ea   :  { %v1568_v21 = vsel %vm1567_vm3, %v1560_v18, %v1566_v19 }
 0x9eb   :  { %v1575_v22 = vadd.f32 %v1573_v20, %v1568_v21 }
 0xa46   :  { %v1655_v23 = vpop.f32.mrb[0].mxu0 }
 0xa47   :  { %v1659_v24 = vadd.f32 %v1655_v23, %v1575_v22  ;;  %v3249_v25 = vpop.f32.mrb[1].mxu0 }
 0xa48   :  { %v1751_v27 = vpop.f32.mrb[0].mxu1 }
 0xa49   :  { %3819 = vtanh.f32 %v1659_v24  ;;  %v3268_v28 = vpop.f32.mrb[1].mxu1 }
 0xa53   :  { %v3820_v26 = vpop.eup %3819 }
 0xa54   :  { %1661 = vst.msk [vmem:[#allocation2] sm:$0x3] %vm72_vm0, %v3820_v26  ;;  %3286 = vmatmul.mubr.msk.f32.vlgmr.msra.gmra.mrb[2].mxu0 %vm1585_vm2, %v3820_v26 }
 0xb27   :  { %v1824_v29 = vpop.f32.mrb[2].mxu0 }
 0xb28   :  { %v1825_v31 = vadd.f32 %v1824_v29, %v1751_v27  ;;  %v3287_v32 = vpop.f32.mrb[3].mxu0 }
 0xb2a   :  { %v1836_v33 = vadd.f32 %v2695_v30, %v1825_v31 }
 0xb2c   :  { %3821 = vtanh.f32 %v1836_v33 }
 0xb36   :  { %v3822_v34 = vpop.eup %3821 }
 0xb37   :  { %1838 = vst.msk [vmem:[#allocation2 + $0x2] sm:$0x3] %vm72_vm0, %v3822_v34 }
 0xb38 PF:  { %p2696_p8 = scmp.le.s32.totalorder %s4373_s0, 6 }
 0xb39   :  { %v1871_v35 = vld [vmem:[#allocation8] sm:$0xff] (!%p2696_p8)  ;;  %v1872_v36 = vld [vmem:[#allocation8 + $0x8] sm:$0xff] (!%p2696_p8)  ;;  %v1873_v37 = vld [vmem:[#allocation8 + $0x10] sm:$0xff] (!%p2696_p8)  ;;  %v3942_v38 = vmov (!%p2696_p8), 0.0|0.0   ;;  %vm3943_vm4 = vmmov (!%p2696_p8), 0   ;;  %v3944_v41 = vmov (!%p2696_p8), 0.0   ;;  %v1849_v17 = vlaneseq (!%p2696_p8) }
 0xb3a   :  { %1842 = sbr.rel (%p2696_p8) target bundleno = 3344 (0xd10), region = 77  ;;  %3656 = vmatprep.subr.bf16.mxu0 (!%p2696_p8), %v3942_v38  ;;  %v3657_v39 = vpack.c.bf16 (!%p2696_p8), %v1872_v36, %v1871_v35  ;;  %v1874_v40 = vld [vmem:[#allocation8 + $0x18] sm:$0xff] (!%p2696_p8)  ;;  %3304 = vmatprep.mubr.msk.f32.mxu0 (!%p2696_p8), %vm3943_vm4, %v3944_v41  ;;  %v3945_v42 = vmov (!%p2696_p8), 6   ;;  %v1875_v44 = vld [vmem:[#allocation8 + $0x20] sm:$0xff] (!%p2696_p8)  ;;  %v1876_v45 = vld [vmem:[#allocation8 + $0x28] sm:$0xff] (!%p2696_p8)  ;;  %vm1879_vm5 = vcmask (!%p2696_p8), 523264  }
 0xb3b   :  { %3823 = vset.pattern.permute.xlu0 (!%p2696_p8), %v3945_v42  ;;  %3668 = vmatprep.subr.bf16.mxu1 (!%p2696_p8), %v3942_v38  ;;  %v3660_v43 = vpack.c.bf16 (!%p2696_p8), %v1874_v40, %v1873_v37  ;;  %v3663_v46 = vpack.c.bf16 (!%p2696_p8), %v1876_v45, %v1875_v44  ;;  %v1968_v47 = vld [vmem:[#allocation8 + $0x40] sm:$0xff] (!%p2696_p8)  ;;  %v1969_v48 = vld [vmem:[#allocation8 + $0x48] sm:$0xff] (!%p2696_p8)  ;;  %v1877_v49 = vld [vmem:[#allocation8 + $0x30] sm:$0xff] (!%p2696_p8)  ;;  %v1850_v18 = vshrl.u32 (!%p2696_p8), %v1849_v17, 7  ;;  %vm1861_vm6 = vcmask (!%p2696_p8), 261120  }
 0xb3c   :  { %3658 = vmatpush3.bf16.msra.mxu0 (!%p2696_p8), %v3657_v39  ;;  %1845 = vperm.xlu0 (!%p2696_p8), %3823, %v4045_v1   ;;  %v1878_v50 = vld [vmem:[#allocation8 + $0x38] sm:$0xff] (!%p2696_p8)  ;;  %v3669_v51 = vpack.c.bf16 (!%p2696_p8), %v1969_v48, %v1968_v47  ;;  %v1957_v53 = vld [vmem:[#allocation5 + $0x40] sm:$0xff] (!%p2696_p8)  ;;  %v1958_v54 = vld [vmem:[#allocation5 + $0x48] sm:$0xff] (!%p2696_p8) }
 0xb3d   :  { %3659 = vmatprep.subr.bf16.mxu0 (!%p2696_p8), %v3942_v38  ;;  %3323 = vmatprep.mubr.msk.f32.mxu1 (!%p2696_p8), %vm3943_vm4, %v3944_v41  ;;  %v3666_v52 = vpack.c.bf16 (!%p2696_p8), %v1878_v50, %v1877_v49  ;;  %v1870_v55 = vld [vmem:[#allocation2] sm:$0x3] (!%p2696_p8)  ;;  %v3681_v56 = vpack.c.bf16 (!%p2696_p8), %v1958_v54, %v1957_v53  ;;  %v1970_v57 = vld [vmem:[#allocation8 + $0x50] sm:$0xff] (!%p2696_p8)  ;;  %v1972_v63 = vld [vmem:[#allocation8 + $0x60] sm:$0xff] (!%p2696_p8)  ;;  %v1851_v20 = vsub.s32 (!%p2696_p8), 0, %v1850_v18 }
 0xb3e   :  { %3670 = vmatpush3.bf16.msra.mxu1 (!%p2696_p8), %v3669_v51  ;;  %v1971_v58 = vld [vmem:[#allocation8 + $0x58] sm:$0xff] (!%p2696_p8)  ;;  %v1959_v60 = vld [vmem:[#allocation5 + $0x50] sm:$0xff] (!%p2696_p8)  ;;  %v1973_v5 = vld [vmem:[#allocation8 + $0x68] sm:$0xff] (!%p2696_p8) }
 0xb3f   :  { %3671 = vmatprep.subr.bf16.mxu1 (!%p2696_p8), %v3942_v38  ;;  %v3672_v59 = vpack.c.bf16 (!%p2696_p8), %v1971_v58, %v1970_v57  ;;  %v1960_v61 = vld [vmem:[#allocation5 + $0x58] sm:$0xff] (!%p2696_p8)  ;;  %v3675_v6 = vpack.c.bf16 (!%p2696_p8), %v1973_v5, %v1972_v63  ;;  %v1961_v7 = vld [vmem:[#allocation5 + $0x60] sm:$0xff] (!%p2696_p8)  ;;  %v1962_v8 = vld [vmem:[#allocation5 + $0x68] sm:$0xff] (!%p2696_p8)  ;;  %v1852_v21 = vrot.slane (!%p2696_p8), %v4055_v3, %v1851_v20  ;;  %v1867_v25 = vrot.slane (!%p2696_p8), %v4060_v4, %v1851_v20 }
 0xb40   :  { %3661 = vmatpush3.bf16.msra.mxu0 (!%p2696_p8), %v3660_v43  ;;  %1857 = vperm.xlu0 (!%p2696_p8), %3823, %v4050_v2   ;;  %v3684_v62 = vpack.c.bf16 (!%p2696_p8), %v1960_v61, %v1959_v60  ;;  %v3687_v9 = vpack.c.bf16 (!%p2696_p8), %v1962_v8, %v1961_v7  ;;  %v1974_v10 = vld [vmem:[#allocation8 + $0x70] sm:$0xff] (!%p2696_p8)  ;;  %v1975_v11 = vld [vmem:[#allocation8 + $0x78] sm:$0xff] (!%p2696_p8) }
 0xb41   :  { %3662 = vmatprep.subr.bf16.mxu0 %v3942_v38  ;;  %v3678_v12 = vpack.c.bf16 %v1975_v11, %v1974_v10  ;;  %v1963_v13 = vld [vmem:[#allocation5 + $0x70] sm:$0xff]  ;;  %v1964_v14 = vld [vmem:[#allocation5 + $0x78] sm:$0xff] }
 0xb42   :  { %3673 = vmatpush3.bf16.msra.mxu1 %v3672_v59  ;;  %v3690_v15 = vpack.c.bf16 %v1964_v14, %v1963_v13  ;;  %v1966_v16 = vld [vmem:[#allocation2 + $0x2] sm:$0x3]  ;;  %v2701_v35 = vld [vmem:[%s4379_s6 + $0x1] ss:$0 sm:$0xff] }
 0xb43   :  { %3674 = vmatprep.subr.bf16.mxu1 %v3942_v38 }
 0xb44   :  { %3664 = vmatpush3.bf16.msra.mxu0 %v3663_v46 }
 0xb45   :  { %3665 = vmatprep.subr.bf16.mxu0 %v3942_v38 }
 0xb46   :  { %3676 = vmatpush3.bf16.msra.mxu1 %v3675_v6 }
 0xb47   :  { %3677 = vmatprep.subr.bf16.mxu1 %v3942_v38 }
 0xb48   :  { %3667 = vmatpush3.bf16.msra.mxu0 %v3666_v52 }
 0xb49   :  { %3680 = vmatprep.subr.bf16.mxu0 %v3942_v38 }
 0xb4a   :  { %3679 = vmatpush3.bf16.msra.mxu1 %v3678_v12 }
 0xb4b   :  { %3305 = vmatmul.mubr.msk.f32.vlgmr.msra.gmra.mrb[0].mxu0 %vm1879_vm5, %v1870_v55 }
 0xb4c   :  { %3682 = vmatpush3.bf16.msra.mxu0 %v3681_v56  ;;  %3342 = vmatprep.mubr.msk.f32.mxu0 %vm3943_vm4, %v3944_v41 }
 0xb4d   :  { %3683 = vmatprep.subr.bf16.mxu0 %v3942_v38  ;;  %3324 = vmatmul.mubr.msk.f32.vlgmr.msra.gmra.mrb[0].mxu1 %vm1879_vm5, %v1966_v16 }
 0xb50   :  { %3685 = vmatpush3.bf16.msra.mxu0 %v3684_v62 }
 0xb51   :  { %3686 = vmatprep.subr.bf16.mxu0 %v3942_v38 }
 0xb54   :  { %3688 = vmatpush3.bf16.msra.mxu0 %v3687_v9 }
 0xb55   :  { %3689 = vmatprep.subr.bf16.mxu0 %v3942_v38 }
 0xb58   :  { %3691 = vmatpush3.bf16.msra.mxu0 %v3690_v15 }
 0xbbb   :  { %v1846_v19 = vpop.permute.xlu0 %1845 }
 0xbbc   :  { %v1854_v23 = vmul.f32 %v1852_v21, %v1846_v19 }
 0xbbf   :  { %v1858_v22 = vpop.permute.xlu0 %1857 }
 0xbc0   :  { %v1860_v24 = vmul.f32 %v1858_v22, %v1852_v21 }
 0xbc2   :  { %v1862_v26 = vsel %vm1861_vm6, %v1854_v23, %v1860_v24 }
 0xbc3   :  { %v1869_v27 = vadd.f32 %v1867_v25, %v1862_v26 }
 0xc1e   :  { %v1949_v28 = vpop.f32.mrb[0].mxu0 }
 0xc1f   :  { %v1953_v29 = vadd.f32 %v1949_v28, %v1869_v27  ;;  %v3306_v30 = vpop.f32.mrb[1].mxu0 }
 0xc20   :  { %v2045_v32 = vpop.f32.mrb[0].mxu1 }
 0xc21   :  { %3824 = vtanh.f32 %v1953_v29  ;;  %v3325_v33 = vpop.f32.mrb[1].mxu1 }
 0xc2b   :  { %v3825_v31 = vpop.eup %3824 }
 0xc2c   :  { %1955 = vst.msk [vmem:[#allocation2] sm:$0x3] %vm72_vm0, %v3825_v31  ;;  %3343 = vmatmul.mubr.msk.f32.vlgmr.msra.gmra.mrb[2].mxu0 %vm1879_vm5, %v3825_v31 }
 0xcff   :  { %v2118_v34 = vpop.f32.mrb[2].mxu0 }
 0xd00   :  { %v2119_v36 = vadd.f32 %v2118_v34, %v2045_v32  ;;  %v3344_v37 = vpop.f32.mrb[3].mxu0 }
 0xd02   :  { %v2130_v38 = vadd.f32 %v2701_v35, %v2119_v36 }
 0xd04   :  { %3826 = vtanh.f32 %v2130_v38 }
 0xd0e   :  { %v3827_v39 = vpop.eup %3826 }
 0xd0f   :  { %2132 = vst.msk [vmem:[#allocation2 + $0x2] sm:$0x3] %vm72_vm0, %v3827_v39 }
 0xd10 PF:  { %p2702_p9 = scmp.le.s32.totalorder %s4373_s0, 7 }
 0xd11   :  { %v2165_v40 = vld [vmem:[#allocation8] sm:$0xff] (!%p2702_p9)  ;;  %v2166_v41 = vld [vmem:[#allocation8 + $0x8] sm:$0xff] (!%p2702_p9)  ;;  %v2167_v42 = vld [vmem:[#allocation8 + $0x10] sm:$0xff] (!%p2702_p9)  ;;  %v3946_v43 = vmov (!%p2702_p9), 0.0|0.0   ;;  %vm3947_vm7 = vmmov (!%p2702_p9), 0   ;;  %v3948_v46 = vmov (!%p2702_p9), 0.0   ;;  %v2143_v20 = vlaneseq (!%p2702_p9) }
 0xd12   :  { %2136 = sbr.rel (%p2702_p9) target bundleno = 3816 (0xee8), region = 81  ;;  %3692 = vmatprep.subr.bf16.mxu0 (!%p2702_p9), %v3946_v43  ;;  %v3693_v44 = vpack.c.bf16 (!%p2702_p9), %v2166_v41, %v2165_v40  ;;  %v2168_v45 = vld [vmem:[#allocation8 + $0x18] sm:$0xff] (!%p2702_p9)  ;;  %3361 = vmatprep.mubr.msk.f32.mxu0 (!%p2702_p9), %vm3947_vm7, %v3948_v46  ;;  %v3949_v47 = vmov (!%p2702_p9), 7   ;;  %v2169_v49 = vld [vmem:[#allocation8 + $0x20] sm:$0xff] (!%p2702_p9)  ;;  %v2170_v50 = vld [vmem:[#allocation8 + $0x28] sm:$0xff] (!%p2702_p9)  ;;  %vm2173_vm8 = vcmask (!%p2702_p9), 523264  }
 0xd13   :  { %3828 = vset.pattern.permute.xlu0 (!%p2702_p9), %v3949_v47  ;;  %3704 = vmatprep.subr.bf16.mxu1 (!%p2702_p9), %v3946_v43  ;;  %v3696_v48 = vpack.c.bf16 (!%p2702_p9), %v2168_v45, %v2167_v42  ;;  %v3699_v51 = vpack.c.bf16 (!%p2702_p9), %v2170_v50, %v2169_v49  ;;  %v2262_v52 = vld [vmem:[#allocation8 + $0x40] sm:$0xff] (!%p2702_p9)  ;;  %v2263_v53 = vld [vmem:[#allocation8 + $0x48] sm:$0xff] (!%p2702_p9)  ;;  %v2171_v54 = vld [vmem:[#allocation8 + $0x30] sm:$0xff] (!%p2702_p9)  ;;  %v2144_v21 = vshrl.u32 (!%p2702_p9), %v2143_v20, 7  ;;  %vm2155_vm9 = vcmask (!%p2702_p9), 261120  }
 0xd14   :  { %3694 = vmatpush3.bf16.msra.mxu0 (!%p2702_p9), %v3693_v44  ;;  %2139 = vperm.xlu0 (!%p2702_p9), %3828, %v4045_v1   ;;  %v2172_v55 = vld [vmem:[#allocation8 + $0x38] sm:$0xff] (!%p2702_p9)  ;;  %v3705_v56 = vpack.c.bf16 (!%p2702_p9), %v2263_v53, %v2262_v52  ;;  %v2251_v57 = vld [vmem:[#allocation5 + $0x40] sm:$0xff] (!%p2702_p9)  ;;  %v2252_v58 = vld [vmem:[#allocation5 + $0x48] sm:$0xff] (!%p2702_p9) }
 0xd15   :  { %3695 = vmatprep.subr.bf16.mxu0 (!%p2702_p9), %v3946_v43  ;;  %3380 = vmatprep.mubr.msk.f32.mxu1 (!%p2702_p9), %vm3947_vm7, %v3948_v46  ;;  %v3702_v1 = vpack.c.bf16 (!%p2702_p9), %v2172_v55, %v2171_v54  ;;  %v2164_v59 = vld [vmem:[#allocation2] sm:$0x3] (!%p2702_p9)  ;;  %v2264_v60 = vld [vmem:[#allocation8 + $0x50] sm:$0xff] (!%p2702_p9)  ;;  %v2266_v7 = vld [vmem:[#allocation8 + $0x60] sm:$0xff] (!%p2702_p9)  ;;  %v2145_v23 = vsub.s32 (!%p2702_p9), 0, %v2144_v21 }
 0xd16   :  { %3706 = vmatpush3.bf16.msra.mxu1 (!%p2702_p9), %v3705_v56  ;;  %v2265_v61 = vld [vmem:[#allocation8 + $0x58] sm:$0xff] (!%p2702_p9)  ;;  %v2253_v63 = vld [vmem:[#allocation5 + $0x50] sm:$0xff] (!%p2702_p9)  ;;  %v2267_v8 = vld [vmem:[#allocation8 + $0x68] sm:$0xff] (!%p2702_p9) }
 0xd17   :  { %3707 = vmatprep.subr.bf16.mxu1 (!%p2702_p9), %v3946_v43  ;;  %v3708_v62 = vpack.c.bf16 (!%p2702_p9), %v2265_v61, %v2264_v60  ;;  %v2254_v5 = vld [vmem:[#allocation5 + $0x58] sm:$0xff] (!%p2702_p9)  ;;  %v3711_v9 = vpack.c.bf16 (!%p2702_p9), %v2267_v8, %v2266_v7  ;;  %v2255_v10 = vld [vmem:[#allocation5 + $0x60] sm:$0xff] (!%p2702_p9)  ;;  %v2256_v11 = vld [vmem:[#allocation5 + $0x68] sm:$0xff] (!%p2702_p9)  ;;  %v2146_v24 = vrot.slane (!%p2702_p9), %v4055_v3, %v2145_v23  ;;  %v2161_v28 = vrot.slane (!%p2702_p9), %v4060_v4, %v2145_v23 }
 0xd18   :  { %3697 = vmatpush3.bf16.msra.mxu0 (!%p2702_p9), %v3696_v48  ;;  %2151 = vperm.xlu0 (!%p2702_p9), %3828, %v4050_v2   ;;  %v3717_v2 = vpack.c.bf16 (!%p2702_p9), %v2252_v58, %v2251_v57  ;;  %v3720_v6 = vpack.c.bf16 (!%p2702_p9), %v2254_v5, %v2253_v63  ;;  %v3723_v12 = vpack.c.bf16 (!%p2702_p9), %v2256_v11, %v2255_v10  ;;  %v2268_v13 = vld [vmem:[#allocation8 + $0x70] sm:$0xff] (!%p2702_p9)  ;;  %v2269_v14 = vld [vmem:[#allocation8 + $0x78] sm:$0xff] (!%p2702_p9) }
 0xd19   :  { %3698 = vmatprep.subr.bf16.mxu0 %v3946_v43  ;;  %v3714_v15 = vpack.c.bf16 %v2269_v14, %v2268_v13  ;;  %v2257_v16 = vld [vmem:[#allocation5 + $0x70] sm:$0xff]  ;;  %v2258_v17 = vld [vmem:[#allocation5 + $0x78] sm:$0xff] }
 0xd1a   :  { %3709 = vmatpush3.bf16.msra.mxu1 %v3708_v62  ;;  %v3726_v18 = vpack.c.bf16 %v2258_v17, %v2257_v16  ;;  %v2260_v19 = vld [vmem:[#allocation2 + $0x2] sm:$0x3]  ;;  %v2707_v37 = vld [vmem:[%s4379_s6 + $0x1] ss:$0 sm:$0xff] }
 0xd1b   :  { %3710 = vmatprep.subr.bf16.mxu1 %v3946_v43 }
 0xd1c   :  { %3700 = vmatpush3.bf16.msra.mxu0 %v3699_v51 }
 0xd1d   :  { %3701 = vmatprep.subr.bf16.mxu0 %v3946_v43 }
 0xd1e   :  { %3712 = vmatpush3.bf16.msra.mxu1 %v3711_v9 }
 0xd1f   :  { %3713 = vmatprep.subr.bf16.mxu1 %v3946_v43 }
 0xd20   :  { %3703 = vmatpush3.bf16.msra.mxu0 %v3702_v1 }
 0xd21   :  { %3716 = vmatprep.subr.bf16.mxu0 %v3946_v43 }
 0xd22   :  { %3715 = vmatpush3.bf16.msra.mxu1 %v3714_v15 }
 0xd23   :  { %3362 = vmatmul.mubr.msk.f32.vlgmr.msra.gmra.mrb[0].mxu0 %vm2173_vm8, %v2164_v59 }
 0xd24   :  { %3718 = vmatpush3.bf16.msra.mxu0 %v3717_v2  ;;  %3399 = vmatprep.mubr.msk.f32.mxu0 %vm3947_vm7, %v3948_v46 }
 0xd25   :  { %3719 = vmatprep.subr.bf16.mxu0 %v3946_v43  ;;  %3381 = vmatmul.mubr.msk.f32.vlgmr.msra.gmra.mrb[0].mxu1 %vm2173_vm8, %v2260_v19 }
 0xd28   :  { %3721 = vmatpush3.bf16.msra.mxu0 %v3720_v6 }
 0xd29   :  { %3722 = vmatprep.subr.bf16.mxu0 %v3946_v43 }
 0xd2c   :  { %3724 = vmatpush3.bf16.msra.mxu0 %v3723_v12 }
 0xd2d   :  { %3725 = vmatprep.subr.bf16.mxu0 %v3946_v43 }
 0xd30   :  { %3727 = vmatpush3.bf16.msra.mxu0 %v3726_v18 }
 0xd93   :  { %v2140_v22 = vpop.permute.xlu0 %2139 }
 0xd94   :  { %v2148_v26 = vmul.f32 %v2146_v24, %v2140_v22 }
 0xd97   :  { %v2152_v25 = vpop.permute.xlu0 %2151 }
 0xd98   :  { %v2154_v27 = vmul.f32 %v2152_v25, %v2146_v24 }
 0xd9a   :  { %v2156_v29 = vsel %vm2155_vm9, %v2148_v26, %v2154_v27 }
 0xd9b   :  { %v2163_v30 = vadd.f32 %v2161_v28, %v2156_v29 }
 0xdf6   :  { %v2243_v31 = vpop.f32.mrb[0].mxu0 }
 0xdf7   :  { %v2247_v32 = vadd.f32 %v2243_v31, %v2163_v30  ;;  %v3363_v33 = vpop.f32.mrb[1].mxu0 }
 0xdf8   :  { %v2339_v35 = vpop.f32.mrb[0].mxu1 }
 0xdf9   :  { %3829 = vtanh.f32 %v2247_v32  ;;  %v3382_v36 = vpop.f32.mrb[1].mxu1 }
 0xe03   :  { %v3830_v34 = vpop.eup %3829 }
 0xe04   :  { %2249 = vst.msk [vmem:[#allocation2] sm:$0x3] %vm72_vm0, %v3830_v34  ;;  %3400 = vmatmul.mubr.msk.f32.vlgmr.msra.gmra.mrb[2].mxu0 %vm2173_vm8, %v3830_v34 }
 0xed7   :  { %v2412_v3 = vpop.f32.mrb[2].mxu0 }
 0xed8   :  { %v2413_v38 = vadd.f32 %v2412_v3, %v2339_v35  ;;  %v3401_v4 = vpop.f32.mrb[3].mxu0 }
 0xeda   :  { %v2424_v39 = vadd.f32 %v2707_v37, %v2413_v38 }
 0xedc   :  { %3831 = vtanh.f32 %v2424_v39 }
 0xee6   :  { %v3832_v40 = vpop.eup %3831 }
 0xee7   :  { %2426 = vst.msk [vmem:[#allocation2 + $0x2] sm:$0x3] %vm72_vm0, %v3832_v40 }
 0xee8 PF:  { %v2429_v41 = vld [vmem:[%s4380_s7] sm:$0xff]  ;;  %v2430_v42 = vld [vmem:[%s4380_s7 + $0x8] sm:$0xff]  ;;  %v2431_v43 = vld [vmem:[%s4380_s7 + $0x10] sm:$0xff]  ;;  %v3950_v44 = vmov 0.0|0.0   ;;  %vm3951_vm0 = vmmov 0   ;;  %vm2444_vm10 = vcmask 523264  }
 0xee9   :  { %3728 = vmatprep.subr.bf16.mxu0 %v3950_v44  ;;  %v3729_v45 = vpack.c.bf16 %v2430_v42, %v2429_v41  ;;  %v2432_v46 = vld [vmem:[%s4380_s7 + $0x18] sm:$0xff]  ;;  %3418 = vmatprep.mubr.msk.f32.mxu0 %vm3951_vm0, %v3917_v0  ;;  %v2519_v48 = vld [vmem:[%s4382_s9] sm:$0xff]  ;;  %v2520_v49 = vld [vmem:[%s4382_s9 + $0x8] sm:$0xff]  ;;  %vm2621_vm11 = vcmask 58400   ;;  %vm2607_vm12 = vcmask 25600   ;;  %vm2639_vm13 = vcmask 31744  }
 0xeea   :  { %3740 = vmatprep.subr.bf16.mxu1 %v3950_v44  ;;  %3437 = vmatprep.mubr.msk.f32.mxu1 %vm3951_vm0, %v3917_v0  ;;  %v3732_v47 = vpack.c.bf16 %v2432_v46, %v2431_v43  ;;  %v2521_v50 = vld [vmem:[%s4382_s9 + $0x10] sm:$0xff]  ;;  %v2433_v51 = vld [vmem:[%s4380_s7 + $0x20] sm:$0xff]  ;;  %v2434_v0 = vld [vmem:[%s4380_s7 + $0x28] sm:$0xff]  ;;  %v3741_v52 = vpack.c.bf16 %v2520_v49, %v2519_v48  ;;  %vm2641_vm14 = vcmask 58368  }
 0xeeb   :  { %3730 = vmatpush3.bf16.msra.mxu0 %v3729_v45  ;;  %v2522_v53 = vld [vmem:[%s4382_s9 + $0x18] sm:$0xff]  ;;  %v3735_v55 = vpack.c.bf16 %v2434_v0, %v2433_v51  ;;  %v2523_v56 = vld [vmem:[%s4382_s9 + $0x20] sm:$0xff]  ;;  %v2524_v1 = vld [vmem:[%s4382_s9 + $0x28] sm:$0xff] }
 0xeec   :  { %3731 = vmatprep.subr.bf16.mxu0 %v3950_v44  ;;  %3742 = vmatpush3.bf16.msra.mxu1 %v3741_v52  ;;  %v3744_v54 = vpack.c.bf16 %v2522_v53, %v2521_v50  ;;  %v2435_v57 = vld [vmem:[%s4380_s7 + $0x30] sm:$0xff]  ;;  %v2436_v58 = vld [vmem:[%s4380_s7 + $0x38] sm:$0xff]  ;;  %v3747_v59 = vpack.c.bf16 %v2524_v1, %v2523_v56  ;;  %v2708_v5 = vld [vmem:[%s4381_s8] ss:$0 sm:$0xff]  ;;  %s3952_s8 = smov 124  }
 0xeed   :  { %3743 = vmatprep.subr.bf16.mxu1 %v3950_v44  ;;  %v3738_v2 = vpack.c.bf16 %v2436_v58, %v2435_v57  ;;  %v2525_v61 = vld [vmem:[%s4382_s9 + $0x30] sm:$0xff]  ;;  %v2526_v62 = vld [vmem:[%s4382_s9 + $0x38] sm:$0xff]  ;;  %v2710_v10 = vld [vmem:[%s4383_s10] ss:$0 sm:$0xff]  ;;  %s3953_s9 = smov [#allocation10]  }
 0xeee   :  { %v2428_v60 = vld [vmem:[#allocation2 + $0x2] sm:$0x3]  ;;  %v3750_v63 = vpack.c.bf16 %v2526_v62, %v2525_v61  ;;  %s2649_s10 = sshll.u32 %s3953_s9, 4  ;;  %s2650_s10 = int_to_ptr.vmem [resolvable:$true] %s2649_s10 }
 0xeef   :  { %3733 = vmatpush3.bf16.msra.mxu0 %v3732_v47  ;;  %s3885_s18 = scalar_lea.vmem %s2650_s10, 32  ;;  %p3890_p11 = scmp.lt.s32.totalorder %s2650_s10, %s2650_s10 }
 0xef0   :  { %3734 = vmatprep.subr.bf16.mxu0 %v3950_v44  ;;  %3745 = vmatpush3.bf16.msra.mxu1 %v3744_v54  ;;  %p3886_p10 = scmp.ne.s32.totalorder %s2650_s10, %s3885_s18  ;;  %p3891_p12 = scmp.lt.s32.totalorder %s3885_s18, %s3885_s18 }
 0xef1   :  { %3746 = vmatprep.subr.bf16.mxu1 %v3950_v44 }
 0xef2   :  { %p3892_p13 = por %p3891_p12, %p3890_p11 }
 0xef3   :  { %3736 = vmatpush3.bf16.msra.mxu0 %v3735_v55 }
 0xef4   :  { %3737 = vmatprep.subr.bf16.mxu0 %v3950_v44  ;;  %3748 = vmatpush3.bf16.msra.mxu1 %v3747_v59  ;;  %p3893_p0 = pnand %p3892_p13, %p3886_p10 }
 0xef5   :  { %3749 = vmatprep.subr.bf16.mxu1 %v3950_v44 }
 0xef7   :  { %3739 = vmatpush3.bf16.msra.mxu0 %v3738_v2 }
 0xef8   :  { %3751 = vmatpush3.bf16.msra.mxu1 %v3750_v63 }
 0xefa   :  { %3419 = vmatmul.mubr.msk.f32.vlgmr.msra.gmra.mrb[0].mxu0 %vm2444_vm10, %v2428_v60 }
 0xfcd   :  { %v2514_v6 = vpop.f32.mrb[0].mxu0 }
 0xfce   :  { %v2515_v7 = vadd.f32 %v2708_v5, %v2514_v6  ;;  %v3420_v8 = vpop.f32.mrb[1].mxu0 }
 0xfd0   :  { %v2518_v9 = vmax.f32 %v2515_v7, 0.0 }
 0xfd2   :  { %3438 = vmatmul.mubr.msk.f32.vlgmr.msra.gmra.mrb[0].mxu1 %vm2444_vm10, %v2518_v9 }
0x10a5   :  { %v2603_v11 = vpop.f32.mrb[0].mxu1 }
0x10a6   :  { %v2604_v12 = vadd.f32 %v2710_v10, %v2603_v11  ;;  %v3439_v13 = vpop.f32.mrb[1].mxu1 }
0x10a8   :  { %v2622_v14 = vsel %vm2621_vm11, %v2604_v12, -inf  ;;  %v2608_v15 = vsel %vm2607_vm12, %v2604_v12, -inf }
0x10a9   :  { %2623 = vmax.xlane.f32.xlu0 %v2622_v14 }
0x10ad   :  { %2609 = vmax.xlane.f32.xlu0 %v2608_v15 }
0x1136   :  { %v2624_v16 = vpop.xlane.xlu0 %2623 }
0x1137   :  { %v2625_v17 = vsub.f32 %v2604_v12, %v2624_v16 }
0x1139   :  { %v2626_v18 = vmul.f32 1.442695, %v2625_v17 }
0x113a   :  { %v2610_v20 = vpop.xlane.xlu0 %2609 }
0x113b   :  { %3833 = vpow2.f32 %v2626_v18  ;;  %v2611_v21 = vsub.f32 %v2604_v12, %v2610_v20 }
0x113d   :  { %v2612_v22 = vmul.f32 1.442695, %v2611_v21 }
0x113f   :  { %3835 = vpow2.f32 %v2612_v22 }
0x1145   :  { %v3834_v19 = vpop.eup %3833 }
0x1146   :  { %2629 = vrot.lane.b32.xlu1 %v3834_v19, %s3952_s8 }
0x1149   :  { %v3836_v23 = vpop.eup %3835 }
0x114a   :  { %v2614_v24 = vsel %vm2607_vm12, %v3836_v23, 0.0 }
0x116a   :  { %2615 = vadd.xlane.f32.xlu1 %v2614_v24 }
0x11b8   :  { %v2630_v25 = vpop.permute.xlu1 %2629 }
0x11b9   :  { %v2632_v26 = vsel %vm2607_vm12, %v2630_v25, 0.0 }
0x11ba   :  { %2633 = vadd.xlane.f32.xlu0 %v2632_v26 }
0x11f7   :  { %v2616_v27 = vpop.xlane.xlu1 %2615 }
0x11f8   :  { %3837 = vlog2.f32 %v2616_v27 }
0x1202   :  { %v3838_v29 = vpop.eup %3837 }
0x1203   :  { %v2618_v30 = vmul.f32 0.6931472, %v3838_v29 }
0x1205   :  { %v2619_v32 = vadd.f32 %v2618_v30, %v2610_v20 }
0x1207   :  { %v2620_v35 = vsub.f32 %v2604_v12, %v2619_v32 }
0x1247   :  { %v2634_v28 = vpop.xlane.xlu0 %2633 }
0x1248   :  { %3839 = vlog2.f32 %v2634_v28 }
0x1252   :  { %v3840_v31 = vpop.eup %3839 }
0x1253   :  { %v2636_v33 = vmul.f32 0.6931472, %v3840_v31 }
0x1255   :  { %v2637_v34 = vadd.f32 %v2636_v33, %v2624_v16 }
0x1257   :  { %v2638_v36 = vsub.f32 %v2604_v12, %v2637_v34 }
0x1259   :  { %v2640_v3 = vsel %vm2639_vm13, %v2620_v35, %v2638_v36 }
0x125a   :  { %2642 = vst.msk [vmem:[#allocation10] sm:$0x3] %vm2641_vm14, %v2640_v3 }
0x125b   :  { %3896 = shalt.err (!%p3893_p0)
}
0x125c   :  { %s3897_s25 = scalar_lea.hbm %s4384_s11, 32 }
0x125d   :  { %p3898_p1 = scmp.ne.s32.totalorder %s4384_s11, %s3897_s25  ;;  %p3901_p2 = scmp.lt.u32.totalorder %s3897_s25, %s4384_s11 }
0x125f   :  { %p3903_p3 = pnand %p3901_p2, %p3898_p1 }
0x1261   :  { %3906 = shalt.err (!%p3903_p3)
}
0x1262   :  { %2652 = dma.vmem_to_hbm [thread:$0]  %s2650_s10, 32, %s4384_s11, [#allocation7]  }
0x1263   :  { %3911 = dma.done.wait [#allocation7], 32  }
0x1264   :  { %3912 = vsyncadd [#allocation7], 4294967264 }
0x1265   :  { %2656 = vsyncpa [#allocation6], 1 }
0x1266   :  { %2657 = vsyncpa [#allocation9], 1 }
0x1267   :  { %2658 = vsyncpa [#allocation7], 1 }

</bundles_post_ra>
